<compile_context>
chip_gen: v7x
topology: tpu7x:2x2x1
jax: 0.10.0
libtpu: 0.0.40
codegen_flags: <defaults>
</compile_context>

<pallas_src>
import jax
import jax.numpy as jnp
from jax.experimental import pallas as pl
from jax.experimental.pallas import tpu as pltpu


def _round_up(x, m):
    return (x + m - 1) // m * m


def _pad_to(x, shape):
    pads = [(0, s - d) for d, s in zip(x.shape, shape)]
    return jnp.pad(x, pads)


def gru_chunk_kernel(gi_r_ref, gi_z_ref, gi_n_ref,
                     whh_r_ref, whh_z_ref, whh_n_ref,
                     bhh_r_ref, bhh_z_ref, bhh_n_ref,
                     h0_ref, h_out_ref, h_scratch):
    """Runs `time_chunk` GRU steps for one batch block.

    gi_*_ref : (Tc, Bblk, Hp)  precomputed input-gate pre-activations (r/z/n)
    whh_*    : (Hp, Hp)        recurrent weights per gate
    bhh_*    : (1, Hp)         recurrent biases per gate
    h0_ref   : (Bblk, Hp)      initial hidden state (encoder last hidden)
    h_out    : (Tc, Bblk, Hp)  hidden state after each step
    h_scratch: (Bblk, Hp)      hidden state carried across time chunks
    """
    # Initialize the carried hidden state at the first time chunk of each batch block.
    @pl.when(pl.program_id(1) == 0)
    def _():
        h_scratch[...] = h0_ref[...]

    tc = gi_r_ref.shape[0]

    def step(i, h):
        gh_r = jnp.dot(h, whh_r_ref[...],
                       preferred_element_type=jnp.float32) + bhh_r_ref[...]
        gh_z = jnp.dot(h, whh_z_ref[...],
                       preferred_element_type=jnp.float32) + bhh_z_ref[...]
        gh_n = jnp.dot(h, whh_n_ref[...],
                       preferred_element_type=jnp.float32) + bhh_n_ref[...]
        r = jax.nn.sigmoid(gi_r_ref[i] + gh_r)
        z = jax.nn.sigmoid(gi_z_ref[i] + gh_z)
        n = jnp.tanh(gi_n_ref[i] + r * gh_n)
        h_new = (1.0 - z) * n + z * h
        h_out_ref[i] = h_new
        return h_new

    # Short fixed trip count -> fully unroll for LLO scheduling visibility.
    h_final = jax.lax.fori_loop(0, tc, step, h_scratch[...], unroll=True)
    h_scratch[...] = h_final


def decoder_forward(params, encoder_last_hidden_state, encoder_output, targets,
                    *, time_chunk=8, batch_block=8):
    """Returns (seq_logProb, seq_predictions) matching decoderRNN.forward."""
    f32 = jnp.float32
    B = encoder_last_hidden_state.shape[1]
    H = params['whh'].shape[0]
    D = params['embedding'].shape[1]
    V_out = params['wo'].shape[1]
    L = targets.shape[1]
    T = L - 1

    enc = encoder_output.astype(f32)                        # (B, S, H)
    h0 = encoder_last_hidden_state[0].astype(f32)           # (B, H)

    # ---- attention, algebraically collapsed (exact: the MLP is purely linear) ----
    # scores[b,s] = cat(enc[b,s], h[b]) @ (W1 W2 W3 W4 wt) + const
    # The h-dependent part and the bias chain are constant over s, so they cancel in
    # softmax(axis=1): attention weights and context are time-invariant.
    w_chain = (params['w1'].astype(f32) @ params['w2'].astype(f32)
               @ params['w3'].astype(f32) @ params['w4'].astype(f32))   # (2H, H)
    v = w_chain @ params['wt'].astype(f32)                              # (2H,)
    v_enc = v[:H]
    scores = jnp.einsum('bsh,h->bs', enc, v_enc,
                        preferred_element_type=jnp.float32)             # (B, S)
    attn = jax.nn.softmax(scores, axis=1)
    context = jnp.einsum('bs,bsh->bh', attn, enc,
                         preferred_element_type=jnp.float32)            # (B, H)

    # ---- GRU input-gate pre-activations for all T steps (one big matmul) ----
    emb = jnp.take(params['embedding'].astype(f32), targets[:, :T], axis=0)  # (B, T, D)
    wih = params['wih'].astype(f32)                                          # (D+H, 3H)
    wih_word, wih_ctx = wih[:D], wih[D:]
    gi_word = jnp.einsum('btd,dk->btk', emb, wih_word,
                         preferred_element_type=jnp.float32)                 # (B, T, 3H)
    gi_const = context @ wih_ctx + params['bih'].astype(f32)[None, :]        # (B, 3H)
    gi = jnp.transpose(gi_word + gi_const[:, None, :], (1, 0, 2))            # (T, B, 3H)
    gi_r, gi_z, gi_n = gi[..., :H], gi[..., H:2 * H], gi[..., 2 * H:]

    # ---- padding to lane/sublane-dense shapes ----
    Hp = _round_up(H, 128)
    Bp = _round_up(B, 8)
    assert batch_block % 8 == 0
    Bblk = batch_block if Bp % batch_block == 0 else 8
    Tc = time_chunk
    Tp = _round_up(max(T, 1), Tc)

    gi_r_p = _pad_to(gi_r, (Tp, Bp, Hp))
    gi_z_p = _pad_to(gi_z, (Tp, Bp, Hp))
    gi_n_p = _pad_to(gi_n, (Tp, Bp, Hp))
    h0_p = _pad_to(h0, (Bp, Hp))

    whh = params['whh'].astype(f32)            # (H, 3H), gate order [r | z | n]
    bhh = params['bhh'].astype(f32)            # (3H,)
    whh_r_p = _pad_to(whh[:, :H], (Hp, Hp))
    whh_z_p = _pad_to(whh[:, H:2 * H], (Hp, Hp))
    whh_n_p = _pad_to(whh[:, 2 * H:], (Hp, Hp))
    bhh_r_p = _pad_to(bhh[:H].reshape(1, H), (1, Hp))
    bhh_z_p = _pad_to(bhh[H:2 * H].reshape(1, H), (1, Hp))
    bhh_n_p = _pad_to(bhh[2 * H:].reshape(1, H), (1, Hp))

    n_b = Bp // Bblk
    n_c = Tp // Tc

    def full_spec(shape):
        nd = len(shape)
        return pl.BlockSpec(shape, lambda b, c, _n=nd: (0,) * _n)

    step_spec = pl.BlockSpec((Tc, Bblk, Hp), lambda b, c: (c, b, 0))

    in_specs = [
        step_spec, step_spec, step_spec,                      # gi_r, gi_z, gi_n
        full_spec((Hp, Hp)), full_spec((Hp, Hp)), full_spec((Hp, Hp)),
        full_spec((1, Hp)), full_spec((1, Hp)), full_spec((1, Hp)),
        pl.BlockSpec((Bblk, Hp), lambda b, c: (b, 0)),        # h0
    ]
    out_specs = pl.BlockSpec((Tc, Bblk, Hp), lambda b, c: (c, b, 0))

    # Explicit VMEM budget (generous margin, stays under the v7x 64 MiB physical cap).
    blk_bytes = Tc * Bblk * Hp * 4
    in_bytes = 3 * blk_bytes + 3 * Hp * Hp * 4 + 3 * 8 * Hp * 4 + Bblk * Hp * 4
    needed = 2 * (in_bytes + blk_bytes) + Bblk * Hp * 4 + (4 << 20)
    vmem_limit = int(min(48 * 2**20, max(16 * 2**20, needed)))

    h_all_p = pl.pallas_call(
        gru_chunk_kernel,
        out_shape=jax.ShapeDtypeStruct((Tp, Bp, Hp), jnp.float32),
        grid_spec=pltpu.PrefetchScalarGridSpec(
            num_scalar_prefetch=0,
            grid=(n_b, n_c),
            in_specs=in_specs,
            out_specs=out_specs,
            scratch_shapes=[pltpu.VMEM((Bblk, Hp), jnp.float32)],
        ),
        compiler_params=pltpu.CompilerParams(
            # batch blocks are independent (v7x megacore); time axis carries state.
            dimension_semantics=("parallel", "arbitrary"),
            vmem_limit_bytes=vmem_limit,
        ),
    )(gi_r_p, gi_z_p, gi_n_p,
      whh_r_p, whh_z_p, whh_n_p,
      bhh_r_p, bhh_z_p, bhh_n_p,
      h0_p)

    # ---- output projection hoisted out of the recurrence (one large matmul) ----
    h_all = jnp.transpose(h_all_p[:T, :B, :H], (1, 0, 2))            # (B, T, H)
    seq_logProb = jnp.einsum('bth,hv->btv', h_all, params['wo'].astype(f32),
                             preferred_element_type=jnp.float32) \
        + params['bo'].astype(f32)                                    # (B, T, V_out)
    seq_predictions = jnp.argmax(seq_logProb, axis=2)                 # (B, T)
    return seq_logProb, seq_predictions


def init_params(key, hidden_size, vocab_size, word_dim, output_size):
    ks = jax.random.split(key, 16)
    u = lambda k, shape: jax.random.uniform(k, shape, jnp.float32, -0.1, 0.1)
    return {
        'embedding': u(ks[0], (vocab_size, word_dim)),
        # attention (weights stored as (in, out))
        'w1': u(ks[1], (2 * hidden_size, hidden_size)), 'b1': u(ks[2], (hidden_size,)),
        'w2': u(ks[3], (hidden_size, hidden_size)),     'b2': u(ks[4], (hidden_size,)),
        'w3': u(ks[5], (hidden_size, hidden_size)),     'b3': u(ks[6], (hidden_size,)),
        'w4': u(ks[7], (hidden_size, hidden_size)),     'b4': u(ks[8], (hidden_size,)),
        'wt': u(ks[9], (hidden_size,)),                 # to_weight (no bias)
        # GRU (input = [word_dim | hidden]); gate column order [r | z | n]
        'wih': u(ks[10], (word_dim + hidden_size, 3 * hidden_size)),
        'whh': u(ks[11], (hidden_size, 3 * hidden_size)),
        'bih': u(ks[12], (3 * hidden_size,)),
        'bhh': u(ks[13], (3 * hidden_size,)),
        # to_final_output
        'wo': u(ks[14], (hidden_size, output_size)),
        'bo': u(ks[15], (output_size,)),
    }


if __name__ == "__main__":
    B, S_enc, H, D, VOCAB, L = 4, 8, 32, 16, 40, 8
    OUTPUT_SIZE = VOCAB

    key = jax.random.PRNGKey(0)
    kp, k1, k2, k3 = jax.random.split(key, 4)

    params = init_params(kp, H, VOCAB, D, OUTPUT_SIZE)
    encoder_last_hidden_state = jax.random.normal(k1, (1, B, H), jnp.float32)
    encoder_output = jax.random.normal(k2, (B, S_enc, H), jnp.float32)
    targets = jax.random.randint(k3, (B, L), 0, VOCAB, jnp.int32)

    seq_logProb, seq_predictions = decoder_forward(
        params, encoder_last_hidden_state, encoder_output, targets)
    jax.block_until_ready((seq_logProb, seq_predictions))

    assert seq_logProb.shape == (B, L - 1, OUTPUT_SIZE)
    assert seq_predictions.shape == (B, L - 1)
    assert bool(jnp.all(jnp.isfinite(seq_logProb)))
    print("KERNEL_OK")
</pallas_src>

<mosaic_0001>
module attributes {stable_mosaic.version = 11 : i64} {
  func.func @gru_chunk_kernel(%arg0: i32, %arg1: i32, %arg2: memref<8x8x128xf32, #tpu.memory_space<vmem>>, %arg3: memref<8x8x128xf32, #tpu.memory_space<vmem>>, %arg4: memref<8x8x128xf32, #tpu.memory_space<vmem>>, %arg5: memref<128x128xf32, #tpu.memory_space<vmem>>, %arg6: memref<128x128xf32, #tpu.memory_space<vmem>>, %arg7: memref<128x128xf32, #tpu.memory_space<vmem>>, %arg8: memref<1x128xf32, #tpu.memory_space<vmem>>, %arg9: memref<1x128xf32, #tpu.memory_space<vmem>>, %arg10: memref<1x128xf32, #tpu.memory_space<vmem>>, %arg11: memref<8x128xf32, #tpu.memory_space<vmem>>, %arg12: memref<8x8x128xf32, #tpu.memory_space<vmem>>, %arg13: memref<8x128xf32, #tpu.memory_space<vmem>>) attributes {dimension_semantics = [#tpu.dimension_semantics<parallel>, #tpu.dimension_semantics<arbitrary>], iteration_bounds = array<i64: 1, 1>, scalar_prefetch = 0 : i64, scratch_operands = 1 : i64, tpu.core_type = #tpu.core_type<tc>, window_params = [{transform_indices = @transform_0, window_bounds = array<i64: 8, 8, 128>}, {transform_indices = @transform_1, window_bounds = array<i64: 8, 8, 128>}, {transform_indices = @transform_2, window_bounds = array<i64: 8, 8, 128>}, {pipeline_mode = #tpu.pipeline_mode<synchronous>, transform_indices = @transform_3, window_bounds = array<i64: 128, 128>}, {pipeline_mode = #tpu.pipeline_mode<synchronous>, transform_indices = @transform_4, window_bounds = array<i64: 128, 128>}, {pipeline_mode = #tpu.pipeline_mode<synchronous>, transform_indices = @transform_5, window_bounds = array<i64: 128, 128>}, {pipeline_mode = #tpu.pipeline_mode<synchronous>, transform_indices = @transform_6, window_bounds = array<i64: 1, 128>}, {pipeline_mode = #tpu.pipeline_mode<synchronous>, transform_indices = @transform_7, window_bounds = array<i64: 1, 128>}, {pipeline_mode = #tpu.pipeline_mode<synchronous>, transform_indices = @transform_8, window_bounds = array<i64: 1, 128>}, {transform_indices = @transform_9, window_bounds = array<i64: 8, 128>}, {transform_indices = @transform_10, window_bounds = array<i64: 8, 8, 128>}]} {
    %c0_i32 = arith.constant 0 : i32
    %0 = arith.cmpi eq, %arg1, %c0_i32 : i32
    %1 = arith.extui %0 : i1 to i32
    %c0_i32_0 = arith.constant 0 : i32
    %2 = arith.cmpi ne, %1, %c0_i32_0 : i32
    scf.if %2 {
      %c0_212 = arith.constant 0 : index
      %c0_213 = arith.constant 0 : index
      %389 = vector.load %arg11[%c0_212, %c0_213] : memref<8x128xf32, #tpu.memory_space<vmem>>, vector<8x128xf32>
      %c0_214 = arith.constant 0 : index
      %c0_215 = arith.constant 0 : index
      %390 = vector.load %arg13[%c0_214, %c0_215] : memref<8x128xf32, #tpu.memory_space<vmem>>, vector<8x128xf32>
      tpu.vector_store %arg13[%c0_214, %c0_215], %389 {strides = array<i32>} : memref<8x128xf32, #tpu.memory_space<vmem>>, vector<8x128xf32>,
    } else {
    }
    %c0 = arith.constant 0 : index
    %c0_1 = arith.constant 0 : index
    %3 = vector.load %arg13[%c0, %c0_1] : memref<8x128xf32, #tpu.memory_space<vmem>>, vector<8x128xf32>
    %c0_i32_2 = arith.constant 0 : i32
    %c0_3 = arith.constant 0 : index
    %c0_4 = arith.constant 0 : index
    %4 = vector.load %arg5[%c0_3, %c0_4] : memref<128x128xf32, #tpu.memory_space<vmem>>, vector<128x128xf32>
    %cst = arith.constant dense<0.000000e+00> : vector<8x128xf32>
    %5 = tpu.matmul %3, %4, %cst {dimension_numbers = #tpu.dot_dimension_numbers<[1], [0], [0], [1], [0, 0, 1, 1], [], []>} : vector<8x128xf32>, vector<128x128xf32>, vector<8x128xf32> -> vector<8x128xf32>
    %c0_5 = arith.constant 0 : index
    %c0_6 = arith.constant 0 : index
    %6 = vector.load %arg8[%c0_5, %c0_6] : memref<1x128xf32, #tpu.memory_space<vmem>>, vector<1x128xf32>
    %7 = vector.broadcast %6 : vector<1x128xf32> to vector<8x128xf32>
    %8 = arith.addf %5, %7 : vector<8x128xf32>
    %c0_7 = arith.constant 0 : index
    %c0_8 = arith.constant 0 : index
    %9 = vector.load %arg6[%c0_7, %c0_8] : memref<128x128xf32, #tpu.memory_space<vmem>>, vector<128x128xf32>
    %cst_9 = arith.constant dense<0.000000e+00> : vector<8x128xf32>
    %10 = tpu.matmul %3, %9, %cst_9 {dimension_numbers = #tpu.dot_dimension_numbers<[1], [0], [0], [1], [0, 0, 1, 1], [], []>} : vector<8x128xf32>, vector<128x128xf32>, vector<8x128xf32> -> vector<8x128xf32>
    %c0_10 = arith.constant 0 : index
    %c0_11 = arith.constant 0 : index
    %11 = vector.load %arg9[%c0_10, %c0_11] : memref<1x128xf32, #tpu.memory_space<vmem>>, vector<1x128xf32>
    %12 = vector.broadcast %11 : vector<1x128xf32> to vector<8x128xf32>
    %13 = arith.addf %10, %12 : vector<8x128xf32>
    %c0_12 = arith.constant 0 : index
    %c0_13 = arith.constant 0 : index
    %14 = vector.load %arg7[%c0_12, %c0_13] : memref<128x128xf32, #tpu.memory_space<vmem>>, vector<128x128xf32>
    %cst_14 = arith.constant dense<0.000000e+00> : vector<8x128xf32>
    %15 = tpu.matmul %3, %14, %cst_14 {dimension_numbers = #tpu.dot_dimension_numbers<[1], [0], [0], [1], [0, 0, 1, 1], [], []>} : vector<8x128xf32>, vector<128x128xf32>, vector<8x128xf32> -> vector<8x128xf32>
    %c0_15 = arith.constant 0 : index
    %c0_16 = arith.constant 0 : index
    %16 = vector.load %arg10[%c0_15, %c0_16] : memref<1x128xf32, #tpu.memory_space<vmem>>, vector<1x128xf32>
    %17 = vector.broadcast %16 : vector<1x128xf32> to vector<8x128xf32>
    %18 = arith.addf %15, %17 : vector<8x128xf32>
    %19 = arith.index_cast %c0_i32_2 : i32 to index
    %c0_17 = arith.constant 0 : index
    %c0_18 = arith.constant 0 : index
    %20 = vector.load %arg2[%19, %c0_17, %c0_18] : memref<8x8x128xf32, #tpu.memory_space<vmem>>, vector<1x8x128xf32>
    %21 = vector.shape_cast %20 : vector<1x8x128xf32> to vector<8x128xf32>
    %22 = arith.addf %21, %8 : vector<8x128xf32>
    %23 = arith.negf %22 : vector<8x128xf32>
    %24 = math.exp %23 : vector<8x128xf32>
    %cst_19 = arith.constant 1.000000e+00 : f32
    %25 = vector.broadcast %cst_19 : f32 to vector<8x128xf32>
    %26 = arith.addf %25, %24 : vector<8x128xf32>
    %27 = arith.divf %25, %26 : vector<8x128xf32>
    %28 = arith.index_cast %c0_i32_2 : i32 to index
    %c0_20 = arith.constant 0 : index
    %c0_21 = arith.constant 0 : index
    %29 = vector.load %arg3[%28, %c0_20, %c0_21] : memref<8x8x128xf32, #tpu.memory_space<vmem>>, vector<1x8x128xf32>
    %30 = vector.shape_cast %29 : vector<1x8x128xf32> to vector<8x128xf32>
    %31 = arith.addf %30, %13 : vector<8x128xf32>
    %32 = arith.negf %31 : vector<8x128xf32>
    %33 = math.exp %32 : vector<8x128xf32>
    %cst_22 = arith.constant 1.000000e+00 : f32
    %34 = vector.broadcast %cst_22 : f32 to vector<8x128xf32>
    %35 = arith.addf %34, %33 : vector<8x128xf32>
    %36 = arith.divf %34, %35 : vector<8x128xf32>
    %37 = arith.index_cast %c0_i32_2 : i32 to index
    %c0_23 = arith.constant 0 : index
    %c0_24 = arith.constant 0 : index
    %38 = vector.load %arg4[%37, %c0_23, %c0_24] : memref<8x8x128xf32, #tpu.memory_space<vmem>>, vector<1x8x128xf32>
    %39 = vector.shape_cast %38 : vector<1x8x128xf32> to vector<8x128xf32>
    %40 = arith.mulf %27, %18 : vector<8x128xf32>
    %41 = arith.addf %39, %40 : vector<8x128xf32>
    %42 = math.tanh %41 : vector<8x128xf32>
    %cst_25 = arith.constant 1.000000e+00 : f32
    %43 = vector.broadcast %cst_25 : f32 to vector<8x128xf32>
    %44 = arith.subf %43, %36 : vector<8x128xf32>
    %45 = arith.mulf %44, %42 : vector<8x128xf32>
    %46 = arith.mulf %36, %3 : vector<8x128xf32>
    %47 = arith.addf %45, %46 : vector<8x128xf32>
    %48 = arith.index_cast %c0_i32_2 : i32 to index
    %c0_26 = arith.constant 0 : index
    %c0_27 = arith.constant 0 : index
    %49 = vector.load %arg12[%48, %c0_26, %c0_27] : memref<8x8x128xf32, #tpu.memory_space<vmem>>, vector<1x8x128xf32>
    %50 = vector.shape_cast %49 : vector<1x8x128xf32> to vector<8x128xf32>
    %51 = vector.shape_cast %47 : vector<8x128xf32> to vector<1x8x128xf32>
    tpu.vector_store %arg12[%48, %c0_26, %c0_27], %51 {strides = array<i32>} : memref<8x8x128xf32, #tpu.memory_space<vmem>>, vector<1x8x128xf32>,
    %c1_i32 = arith.constant 1 : i32
    %c0_28 = arith.constant 0 : index
    %c0_29 = arith.constant 0 : index
    %52 = vector.load %arg5[%c0_28, %c0_29] : memref<128x128xf32, #tpu.memory_space<vmem>>, vector<128x128xf32>
    %cst_30 = arith.constant dense<0.000000e+00> : vector<8x128xf32>
    %53 = tpu.matmul %47, %52, %cst_30 {dimension_numbers = #tpu.dot_dimension_numbers<[1], [0], [0], [1], [0, 0, 1, 1], [], []>} : vector<8x128xf32>, vector<128x128xf32>, vector<8x128xf32> -> vector<8x128xf32>
    %c0_31 = arith.constant 0 : index
    %c0_32 = arith.constant 0 : index
    %54 = vector.load %arg8[%c0_31, %c0_32] : memref<1x128xf32, #tpu.memory_space<vmem>>, vector<1x128xf32>
    %55 = vector.broadcast %54 : vector<1x128xf32> to vector<8x128xf32>
    %56 = arith.addf %53, %55 : vector<8x128xf32>
    %c0_33 = arith.constant 0 : index
    %c0_34 = arith.constant 0 : index
    %57 = vector.load %arg6[%c0_33, %c0_34] : memref<128x128xf32, #tpu.memory_space<vmem>>, vector<128x128xf32>
    %cst_35 = arith.constant dense<0.000000e+00> : vector<8x128xf32>
    %58 = tpu.matmul %47, %57, %cst_35 {dimension_numbers = #tpu.dot_dimension_numbers<[1], [0], [0], [1], [0, 0, 1, 1], [], []>} : vector<8x128xf32>, vector<128x128xf32>, vector<8x128xf32> -> vector<8x128xf32>
    %c0_36 = arith.constant 0 : index
    %c0_37 = arith.constant 0 : index
    %59 = vector.load %arg9[%c0_36, %c0_37] : memref<1x128xf32, #tpu.memory_space<vmem>>, vector<1x128xf32>
    %60 = vector.broadcast %59 : vector<1x128xf32> to vector<8x128xf32>
    %61 = arith.addf %58, %60 : vector<8x128xf32>
    %c0_38 = arith.constant 0 : index
    %c0_39 = arith.constant 0 : index
    %62 = vector.load %arg7[%c0_38, %c0_39] : memref<128x128xf32, #tpu.memory_space<vmem>>, vector<128x128xf32>
    %cst_40 = arith.constant dense<0.000000e+00> : vector<8x128xf32>
    %63 = tpu.matmul %47, %62, %cst_40 {dimension_numbers = #tpu.dot_dimension_numbers<[1], [0], [0], [1], [0, 0, 1, 1], [], []>} : vector<8x128xf32>, vector<128x128xf32>, vector<8x128xf32> -> vector<8x128xf32>
    %c0_41 = arith.constant 0 : index
    %c0_42 = arith.constant 0 : index
    %64 = vector.load %arg10[%c0_41, %c0_42] : memref<1x128xf32, #tpu.memory_space<vmem>>, vector<1x128xf32>
    %65 = vector.broadcast %64 : vector<1x128xf32> to vector<8x128xf32>
    %66 = arith.addf %63, %65 : vector<8x128xf32>
    %67 = arith.index_cast %c1_i32 : i32 to index
    %c0_43 = arith.constant 0 : index
    %c0_44 = arith.constant 0 : index
    %68 = vector.load %arg2[%67, %c0_43, %c0_44] : memref<8x8x128xf32, #tpu.memory_space<vmem>>, vector<1x8x128xf32>
    %69 = vector.shape_cast %68 : vector<1x8x128xf32> to vector<8x128xf32>
    %70 = arith.addf %69, %56 : vector<8x128xf32>
    %71 = arith.negf %70 : vector<8x128xf32>
    %72 = math.exp %71 : vector<8x128xf32>
    %cst_45 = arith.constant 1.000000e+00 : f32
    %73 = vector.broadcast %cst_45 : f32 to vector<8x128xf32>
    %74 = arith.addf %73, %72 : vector<8x128xf32>
    %75 = arith.divf %73, %74 : vector<8x128xf32>
    %76 = arith.index_cast %c1_i32 : i32 to index
    %c0_46 = arith.constant 0 : index
    %c0_47 = arith.constant 0 : index
    %77 = vector.load %arg3[%76, %c0_46, %c0_47] : memref<8x8x128xf32, #tpu.memory_space<vmem>>, vector<1x8x128xf32>
    %78 = vector.shape_cast %77 : vector<1x8x128xf32> to vector<8x128xf32>
    %79 = arith.addf %78, %61 : vector<8x128xf32>
    %80 = arith.negf %79 : vector<8x128xf32>
    %81 = math.exp %80 : vector<8x128xf32>
    %cst_48 = arith.constant 1.000000e+00 : f32
    %82 = vector.broadcast %cst_48 : f32 to vector<8x128xf32>
    %83 = arith.addf %82, %81 : vector<8x128xf32>
    %84 = arith.divf %82, %83 : vector<8x128xf32>
    %85 = arith.index_cast %c1_i32 : i32 to index
    %c0_49 = arith.constant 0 : index
    %c0_50 = arith.constant 0 : index
    %86 = vector.load %arg4[%85, %c0_49, %c0_50] : memref<8x8x128xf32, #tpu.memory_space<vmem>>, vector<1x8x128xf32>
    %87 = vector.shape_cast %86 : vector<1x8x128xf32> to vector<8x128xf32>
    %88 = arith.mulf %75, %66 : vector<8x128xf32>
    %89 = arith.addf %87, %88 : vector<8x128xf32>
    %90 = math.tanh %89 : vector<8x128xf32>
    %cst_51 = arith.constant 1.000000e+00 : f32
    %91 = vector.broadcast %cst_51 : f32 to vector<8x128xf32>
    %92 = arith.subf %91, %84 : vector<8x128xf32>
    %93 = arith.mulf %92, %90 : vector<8x128xf32>
    %94 = arith.mulf %84, %47 : vector<8x128xf32>
    %95 = arith.addf %93, %94 : vector<8x128xf32>
    %96 = arith.index_cast %c1_i32 : i32 to index
    %c0_52 = arith.constant 0 : index
    %c0_53 = arith.constant 0 : index
    %97 = vector.load %arg12[%96, %c0_52, %c0_53] : memref<8x8x128xf32, #tpu.memory_space<vmem>>, vector<1x8x128xf32>
    %98 = vector.shape_cast %97 : vector<1x8x128xf32> to vector<8x128xf32>
    %99 = vector.shape_cast %95 : vector<8x128xf32> to vector<1x8x128xf32>
    tpu.vector_store %arg12[%96, %c0_52, %c0_53], %99 {strides = array<i32>} : memref<8x8x128xf32, #tpu.memory_space<vmem>>, vector<1x8x128xf32>,
    %c2_i32 = arith.constant 2 : i32
    %c0_54 = arith.constant 0 : index
    %c0_55 = arith.constant 0 : index
    %100 = vector.load %arg5[%c0_54, %c0_55] : memref<128x128xf32, #tpu.memory_space<vmem>>, vector<128x128xf32>
    %cst_56 = arith.constant dense<0.000000e+00> : vector<8x128xf32>
    %101 = tpu.matmul %95, %100, %cst_56 {dimension_numbers = #tpu.dot_dimension_numbers<[1], [0], [0], [1], [0, 0, 1, 1], [], []>} : vector<8x128xf32>, vector<128x128xf32>, vector<8x128xf32> -> vector<8x128xf32>
    %c0_57 = arith.constant 0 : index
    %c0_58 = arith.constant 0 : index
    %102 = vector.load %arg8[%c0_57, %c0_58] : memref<1x128xf32, #tpu.memory_space<vmem>>, vector<1x128xf32>
    %103 = vector.broadcast %102 : vector<1x128xf32> to vector<8x128xf32>
    %104 = arith.addf %101, %103 : vector<8x128xf32>
    %c0_59 = arith.constant 0 : index
    %c0_60 = arith.constant 0 : index
    %105 = vector.load %arg6[%c0_59, %c0_60] : memref<128x128xf32, #tpu.memory_space<vmem>>, vector<128x128xf32>
    %cst_61 = arith.constant dense<0.000000e+00> : vector<8x128xf32>
    %106 = tpu.matmul %95, %105, %cst_61 {dimension_numbers = #tpu.dot_dimension_numbers<[1], [0], [0], [1], [0, 0, 1, 1], [], []>} : vector<8x128xf32>, vector<128x128xf32>, vector<8x128xf32> -> vector<8x128xf32>
    %c0_62 = arith.constant 0 : index
    %c0_63 = arith.constant 0 : index
    %107 = vector.load %arg9[%c0_62, %c0_63] : memref<1x128xf32, #tpu.memory_space<vmem>>, vector<1x128xf32>
    %108 = vector.broadcast %107 : vector<1x128xf32> to vector<8x128xf32>
    %109 = arith.addf %106, %108 : vector<8x128xf32>
    %c0_64 = arith.constant 0 : index
    %c0_65 = arith.constant 0 : index
    %110 = vector.load %arg7[%c0_64, %c0_65] : memref<128x128xf32, #tpu.memory_space<vmem>>, vector<128x128xf32>
    %cst_66 = arith.constant dense<0.000000e+00> : vector<8x128xf32>
    %111 = tpu.matmul %95, %110, %cst_66 {dimension_numbers = #tpu.dot_dimension_numbers<[1], [0], [0], [1], [0, 0, 1, 1], [], []>} : vector<8x128xf32>, vector<128x128xf32>, vector<8x128xf32> -> vector<8x128xf32>
    %c0_67 = arith.constant 0 : index
    %c0_68 = arith.constant 0 : index
    %112 = vector.load %arg10[%c0_67, %c0_68] : memref<1x128xf32, #tpu.memory_space<vmem>>, vector<1x128xf32>
    %113 = vector.broadcast %112 : vector<1x128xf32> to vector<8x128xf32>
    %114 = arith.addf %111, %113 : vector<8x128xf32>
    %115 = arith.index_cast %c2_i32 : i32 to index
    %c0_69 = arith.constant 0 : index
    %c0_70 = arith.constant 0 : index
    %116 = vector.load %arg2[%115, %c0_69, %c0_70] : memref<8x8x128xf32, #tpu.memory_space<vmem>>, vector<1x8x128xf32>
    %117 = vector.shape_cast %116 : vector<1x8x128xf32> to vector<8x128xf32>
    %118 = arith.addf %117, %104 : vector<8x128xf32>
    %119 = arith.negf %118 : vector<8x128xf32>
    %120 = math.exp %119 : vector<8x128xf32>
    %cst_71 = arith.constant 1.000000e+00 : f32
    %121 = vector.broadcast %cst_71 : f32 to vector<8x128xf32>
    %122 = arith.addf %121, %120 : vector<8x128xf32>
    %123 = arith.divf %121, %122 : vector<8x128xf32>
    %124 = arith.index_cast %c2_i32 : i32 to index
    %c0_72 = arith.constant 0 : index
    %c0_73 = arith.constant 0 : index
    %125 = vector.load %arg3[%124, %c0_72, %c0_73] : memref<8x8x128xf32, #tpu.memory_space<vmem>>, vector<1x8x128xf32>
    %126 = vector.shape_cast %125 : vector<1x8x128xf32> to vector<8x128xf32>
    %127 = arith.addf %126, %109 : vector<8x128xf32>
    %128 = arith.negf %127 : vector<8x128xf32>
    %129 = math.exp %128 : vector<8x128xf32>
    %cst_74 = arith.constant 1.000000e+00 : f32
    %130 = vector.broadcast %cst_74 : f32 to vector<8x128xf32>
    %131 = arith.addf %130, %129 : vector<8x128xf32>
    %132 = arith.divf %130, %131 : vector<8x128xf32>
    %133 = arith.index_cast %c2_i32 : i32 to index
    %c0_75 = arith.constant 0 : index
    %c0_76 = arith.constant 0 : index
    %134 = vector.load %arg4[%133, %c0_75, %c0_76] : memref<8x8x128xf32, #tpu.memory_space<vmem>>, vector<1x8x128xf32>
    %135 = vector.shape_cast %134 : vector<1x8x128xf32> to vector<8x128xf32>
    %136 = arith.mulf %123, %114 : vector<8x128xf32>
    %137 = arith.addf %135, %136 : vector<8x128xf32>
    %138 = math.tanh %137 : vector<8x128xf32>
    %cst_77 = arith.constant 1.000000e+00 : f32
    %139 = vector.broadcast %cst_77 : f32 to vector<8x128xf32>
    %140 = arith.subf %139, %132 : vector<8x128xf32>
    %141 = arith.mulf %140, %138 : vector<8x128xf32>
    %142 = arith.mulf %132, %95 : vector<8x128xf32>
    %143 = arith.addf %141, %142 : vector<8x128xf32>
    %144 = arith.index_cast %c2_i32 : i32 to index
    %c0_78 = arith.constant 0 : index
    %c0_79 = arith.constant 0 : index
    %145 = vector.load %arg12[%144, %c0_78, %c0_79] : memref<8x8x128xf32, #tpu.memory_space<vmem>>, vector<1x8x128xf32>
    %146 = vector.shape_cast %145 : vector<1x8x128xf32> to vector<8x128xf32>
    %147 = vector.shape_cast %143 : vector<8x128xf32> to vector<1x8x128xf32>
    tpu.vector_store %arg12[%144, %c0_78, %c0_79], %147 {strides = array<i32>} : memref<8x8x128xf32, #tpu.memory_space<vmem>>, vector<1x8x128xf32>,
    %c3_i32 = arith.constant 3 : i32
    %c0_80 = arith.constant 0 : index
    %c0_81 = arith.constant 0 : index
    %148 = vector.load %arg5[%c0_80, %c0_81] : memref<128x128xf32, #tpu.memory_space<vmem>>, vector<128x128xf32>
    %cst_82 = arith.constant dense<0.000000e+00> : vector<8x128xf32>
    %149 = tpu.matmul %143, %148, %cst_82 {dimension_numbers = #tpu.dot_dimension_numbers<[1], [0], [0], [1], [0, 0, 1, 1], [], []>} : vector<8x128xf32>, vector<128x128xf32>, vector<8x128xf32> -> vector<8x128xf32>
    %c0_83 = arith.constant 0 : index
    %c0_84 = arith.constant 0 : index
    %150 = vector.load %arg8[%c0_83, %c0_84] : memref<1x128xf32, #tpu.memory_space<vmem>>, vector<1x128xf32>
    %151 = vector.broadcast %150 : vector<1x128xf32> to vector<8x128xf32>
    %152 = arith.addf %149, %151 : vector<8x128xf32>
    %c0_85 = arith.constant 0 : index
    %c0_86 = arith.constant 0 : index
    %153 = vector.load %arg6[%c0_85, %c0_86] : memref<128x128xf32, #tpu.memory_space<vmem>>, vector<128x128xf32>
    %cst_87 = arith.constant dense<0.000000e+00> : vector<8x128xf32>
    %154 = tpu.matmul %143, %153, %cst_87 {dimension_numbers = #tpu.dot_dimension_numbers<[1], [0], [0], [1], [0, 0, 1, 1], [], []>} : vector<8x128xf32>, vector<128x128xf32>, vector<8x128xf32> -> vector<8x128xf32>
    %c0_88 = arith.constant 0 : index
    %c0_89 = arith.constant 0 : index
    %155 = vector.load %arg9[%c0_88, %c0_89] : memref<1x128xf32, #tpu.memory_space<vmem>>, vector<1x128xf32>
    %156 = vector.broadcast %155 : vector<1x128xf32> to vector<8x128xf32>
    %157 = arith.addf %154, %156 : vector<8x128xf32>
    %c0_90 = arith.constant 0 : index
    %c0_91 = arith.constant 0 : index
    %158 = vector.load %arg7[%c0_90, %c0_91] : memref<128x128xf32, #tpu.memory_space<vmem>>, vector<128x128xf32>
    %cst_92 = arith.constant dense<0.000000e+00> : vector<8x128xf32>
    %159 = tpu.matmul %143, %158, %cst_92 {dimension_numbers = #tpu.dot_dimension_numbers<[1], [0], [0], [1], [0, 0, 1, 1], [], []>} : vector<8x128xf32>, vector<128x128xf32>, vector<8x128xf32> -> vector<8x128xf32>
    %c0_93 = arith.constant 0 : index
    %c0_94 = arith.constant 0 : index
    %160 = vector.load %arg10[%c0_93, %c0_94] : memref<1x128xf32, #tpu.memory_space<vmem>>, vector<1x128xf32>
    %161 = vector.broadcast %160 : vector<1x128xf32> to vector<8x128xf32>
    %162 = arith.addf %159, %161 : vector<8x128xf32>
    %163 = arith.index_cast %c3_i32 : i32 to index
    %c0_95 = arith.constant 0 : index
    %c0_96 = arith.constant 0 : index
    %164 = vector.load %arg2[%163, %c0_95, %c0_96] : memref<8x8x128xf32, #tpu.memory_space<vmem>>, vector<1x8x128xf32>
    %165 = vector.shape_cast %164 : vector<1x8x128xf32> to vector<8x128xf32>
    %166 = arith.addf %165, %152 : vector<8x128xf32>
    %167 = arith.negf %166 : vector<8x128xf32>
    %168 = math.exp %167 : vector<8x128xf32>
    %cst_97 = arith.constant 1.000000e+00 : f32
    %169 = vector.broadcast %cst_97 : f32 to vector<8x128xf32>
    %170 = arith.addf %169, %168 : vector<8x128xf32>
    %171 = arith.divf %169, %170 : vector<8x128xf32>
    %172 = arith.index_cast %c3_i32 : i32 to index
    %c0_98 = arith.constant 0 : index
    %c0_99 = arith.constant 0 : index
    %173 = vector.load %arg3[%172, %c0_98, %c0_99] : memref<8x8x128xf32, #tpu.memory_space<vmem>>, vector<1x8x128xf32>
    %174 = vector.shape_cast %173 : vector<1x8x128xf32> to vector<8x128xf32>
    %175 = arith.addf %174, %157 : vector<8x128xf32>
    %176 = arith.negf %175 : vector<8x128xf32>
    %177 = math.exp %176 : vector<8x128xf32>
    %cst_100 = arith.constant 1.000000e+00 : f32
    %178 = vector.broadcast %cst_100 : f32 to vector<8x128xf32>
    %179 = arith.addf %178, %177 : vector<8x128xf32>
    %180 = arith.divf %178, %179 : vector<8x128xf32>
    %181 = arith.index_cast %c3_i32 : i32 to index
    %c0_101 = arith.constant 0 : index
    %c0_102 = arith.constant 0 : index
    %182 = vector.load %arg4[%181, %c0_101, %c0_102] : memref<8x8x128xf32, #tpu.memory_space<vmem>>, vector<1x8x128xf32>
    %183 = vector.shape_cast %182 : vector<1x8x128xf32> to vector<8x128xf32>
    %184 = arith.mulf %171, %162 : vector<8x128xf32>
    %185 = arith.addf %183, %184 : vector<8x128xf32>
    %186 = math.tanh %185 : vector<8x128xf32>
    %cst_103 = arith.constant 1.000000e+00 : f32
    %187 = vector.broadcast %cst_103 : f32 to vector<8x128xf32>
    %188 = arith.subf %187, %180 : vector<8x128xf32>
    %189 = arith.mulf %188, %186 : vector<8x128xf32>
    %190 = arith.mulf %180, %143 : vector<8x128xf32>
    %191 = arith.addf %189, %190 : vector<8x128xf32>
    %192 = arith.index_cast %c3_i32 : i32 to index
    %c0_104 = arith.constant 0 : index
    %c0_105 = arith.constant 0 : index
    %193 = vector.load %arg12[%192, %c0_104, %c0_105] : memref<8x8x128xf32, #tpu.memory_space<vmem>>, vector<1x8x128xf32>
    %194 = vector.shape_cast %193 : vector<1x8x128xf32> to vector<8x128xf32>
    %195 = vector.shape_cast %191 : vector<8x128xf32> to vector<1x8x128xf32>
    tpu.vector_store %arg12[%192, %c0_104, %c0_105], %195 {strides = array<i32>} : memref<8x8x128xf32, #tpu.memory_space<vmem>>, vector<1x8x128xf32>,
    %c4_i32 = arith.constant 4 : i32
    %c0_106 = arith.constant 0 : index
    %c0_107 = arith.constant 0 : index
    %196 = vector.load %arg5[%c0_106, %c0_107] : memref<128x128xf32, #tpu.memory_space<vmem>>, vector<128x128xf32>
    %cst_108 = arith.constant dense<0.000000e+00> : vector<8x128xf32>
    %197 = tpu.matmul %191, %196, %cst_108 {dimension_numbers = #tpu.dot_dimension_numbers<[1], [0], [0], [1], [0, 0, 1, 1], [], []>} : vector<8x128xf32>, vector<128x128xf32>, vector<8x128xf32> -> vector<8x128xf32>
    %c0_109 = arith.constant 0 : index
    %c0_110 = arith.constant 0 : index
    %198 = vector.load %arg8[%c0_109, %c0_110] : memref<1x128xf32, #tpu.memory_space<vmem>>, vector<1x128xf32>
    %199 = vector.broadcast %198 : vector<1x128xf32> to vector<8x128xf32>
    %200 = arith.addf %197, %199 : vector<8x128xf32>
    %c0_111 = arith.constant 0 : index
    %c0_112 = arith.constant 0 : index
    %201 = vector.load %arg6[%c0_111, %c0_112] : memref<128x128xf32, #tpu.memory_space<vmem>>, vector<128x128xf32>
    %cst_113 = arith.constant dense<0.000000e+00> : vector<8x128xf32>
    %202 = tpu.matmul %191, %201, %cst_113 {dimension_numbers = #tpu.dot_dimension_numbers<[1], [0], [0], [1], [0, 0, 1, 1], [], []>} : vector<8x128xf32>, vector<128x128xf32>, vector<8x128xf32> -> vector<8x128xf32>
    %c0_114 = arith.constant 0 : index
    %c0_115 = arith.constant 0 : index
    %203 = vector.load %arg9[%c0_114, %c0_115] : memref<1x128xf32, #tpu.memory_space<vmem>>, vector<1x128xf32>
    %204 = vector.broadcast %203 : vector<1x128xf32> to vector<8x128xf32>
    %205 = arith.addf %202, %204 : vector<8x128xf32>
    %c0_116 = arith.constant 0 : index
    %c0_117 = arith.constant 0 : index
    %206 = vector.load %arg7[%c0_116, %c0_117] : memref<128x128xf32, #tpu.memory_space<vmem>>, vector<128x128xf32>
    %cst_118 = arith.constant dense<0.000000e+00> : vector<8x128xf32>
    %207 = tpu.matmul %191, %206, %cst_118 {dimension_numbers = #tpu.dot_dimension_numbers<[1], [0], [0], [1], [0, 0, 1, 1], [], []>} : vector<8x128xf32>, vector<128x128xf32>, vector<8x128xf32> -> vector<8x128xf32>
    %c0_119 = arith.constant 0 : index
    %c0_120 = arith.constant 0 : index
    %208 = vector.load %arg10[%c0_119, %c0_120] : memref<1x128xf32, #tpu.memory_space<vmem>>, vector<1x128xf32>
    %209 = vector.broadcast %208 : vector<1x128xf32> to vector<8x128xf32>
    %210 = arith.addf %207, %209 : vector<8x128xf32>
    %211 = arith.index_cast %c4_i32 : i32 to index
    %c0_121 = arith.constant 0 : index
    %c0_122 = arith.constant 0 : index
    %212 = vector.load %arg2[%211, %c0_121, %c0_122] : memref<8x8x128xf32, #tpu.memory_space<vmem>>, vector<1x8x128xf32>
    %213 = vector.shape_cast %212 : vector<1x8x128xf32> to vector<8x128xf32>
    %214 = arith.addf %213, %200 : vector<8x128xf32>
    %215 = arith.negf %214 : vector<8x128xf32>
    %216 = math.exp %215 : vector<8x128xf32>
    %cst_123 = arith.constant 1.000000e+00 : f32
    %217 = vector.broadcast %cst_123 : f32 to vector<8x128xf32>
    %218 = arith.addf %217, %216 : vector<8x128xf32>
    %219 = arith.divf %217, %218 : vector<8x128xf32>
    %220 = arith.index_cast %c4_i32 : i32 to index
    %c0_124 = arith.constant 0 : index
    %c0_125 = arith.constant 0 : index
    %221 = vector.load %arg3[%220, %c0_124, %c0_125] : memref<8x8x128xf32, #tpu.memory_space<vmem>>, vector<1x8x128xf32>
    %222 = vector.shape_cast %221 : vector<1x8x128xf32> to vector<8x128xf32>
    %223 = arith.addf %222, %205 : vector<8x128xf32>
    %224 = arith.negf %223 : vector<8x128xf32>
    %225 = math.exp %224 : vector<8x128xf32>
    %cst_126 = arith.constant 1.000000e+00 : f32
    %226 = vector.broadcast %cst_126 : f32 to vector<8x128xf32>
    %227 = arith.addf %226, %225 : vector<8x128xf32>
    %228 = arith.divf %226, %227 : vector<8x128xf32>
    %229 = arith.index_cast %c4_i32 : i32 to index
    %c0_127 = arith.constant 0 : index
    %c0_128 = arith.constant 0 : index
    %230 = vector.load %arg4[%229, %c0_127, %c0_128] : memref<8x8x128xf32, #tpu.memory_space<vmem>>, vector<1x8x128xf32>
    %231 = vector.shape_cast %230 : vector<1x8x128xf32> to vector<8x128xf32>
    %232 = arith.mulf %219, %210 : vector<8x128xf32>
    %233 = arith.addf %231, %232 : vector<8x128xf32>
    %234 = math.tanh %233 : vector<8x128xf32>
    %cst_129 = arith.constant 1.000000e+00 : f32
    %235 = vector.broadcast %cst_129 : f32 to vector<8x128xf32>
    %236 = arith.subf %235, %228 : vector<8x128xf32>
    %237 = arith.mulf %236, %234 : vector<8x128xf32>
    %238 = arith.mulf %228, %191 : vector<8x128xf32>
    %239 = arith.addf %237, %238 : vector<8x128xf32>
    %240 = arith.index_cast %c4_i32 : i32 to index
    %c0_130 = arith.constant 0 : index
    %c0_131 = arith.constant 0 : index
    %241 = vector.load %arg12[%240, %c0_130, %c0_131] : memref<8x8x128xf32, #tpu.memory_space<vmem>>, vector<1x8x128xf32>
    %242 = vector.shape_cast %241 : vector<1x8x128xf32> to vector<8x128xf32>
    %243 = vector.shape_cast %239 : vector<8x128xf32> to vector<1x8x128xf32>
    tpu.vector_store %arg12[%240, %c0_130, %c0_131], %243 {strides = array<i32>} : memref<8x8x128xf32, #tpu.memory_space<vmem>>, vector<1x8x128xf32>,
    %c5_i32 = arith.constant 5 : i32
    %c0_132 = arith.constant 0 : index
    %c0_133 = arith.constant 0 : index
    %244 = vector.load %arg5[%c0_132, %c0_133] : memref<128x128xf32, #tpu.memory_space<vmem>>, vector<128x128xf32>
    %cst_134 = arith.constant dense<0.000000e+00> : vector<8x128xf32>
    %245 = tpu.matmul %239, %244, %cst_134 {dimension_numbers = #tpu.dot_dimension_numbers<[1], [0], [0], [1], [0, 0, 1, 1], [], []>} : vector<8x128xf32>, vector<128x128xf32>, vector<8x128xf32> -> vector<8x128xf32>
    %c0_135 = arith.constant 0 : index
    %c0_136 = arith.constant 0 : index
    %246 = vector.load %arg8[%c0_135, %c0_136] : memref<1x128xf32, #tpu.memory_space<vmem>>, vector<1x128xf32>
    %247 = vector.broadcast %246 : vector<1x128xf32> to vector<8x128xf32>
    %248 = arith.addf %245, %247 : vector<8x128xf32>
    %c0_137 = arith.constant 0 : index
    %c0_138 = arith.constant 0 : index
    %249 = vector.load %arg6[%c0_137, %c0_138] : memref<128x128xf32, #tpu.memory_space<vmem>>, vector<128x128xf32>
    %cst_139 = arith.constant dense<0.000000e+00> : vector<8x128xf32>
    %250 = tpu.matmul %239, %249, %cst_139 {dimension_numbers = #tpu.dot_dimension_numbers<[1], [0], [0], [1], [0, 0, 1, 1], [], []>} : vector<8x128xf32>, vector<128x128xf32>, vector<8x128xf32> -> vector<8x128xf32>
    %c0_140 = arith.constant 0 : index
    %c0_141 = arith.constant 0 : index
    %251 = vector.load %arg9[%c0_140, %c0_141] : memref<1x128xf32, #tpu.memory_space<vmem>>, vector<1x128xf32>
    %252 = vector.broadcast %251 : vector<1x128xf32> to vector<8x128xf32>
    %253 = arith.addf %250, %252 : vector<8x128xf32>
    %c0_142 = arith.constant 0 : index
    %c0_143 = arith.constant 0 : index
    %254 = vector.load %arg7[%c0_142, %c0_143] : memref<128x128xf32, #tpu.memory_space<vmem>>, vector<128x128xf32>
    %cst_144 = arith.constant dense<0.000000e+00> : vector<8x128xf32>
    %255 = tpu.matmul %239, %254, %cst_144 {dimension_numbers = #tpu.dot_dimension_numbers<[1], [0], [0], [1], [0, 0, 1, 1], [], []>} : vector<8x128xf32>, vector<128x128xf32>, vector<8x128xf32> -> vector<8x128xf32>
    %c0_145 = arith.constant 0 : index
    %c0_146 = arith.constant 0 : index
    %256 = vector.load %arg10[%c0_145, %c0_146] : memref<1x128xf32, #tpu.memory_space<vmem>>, vector<1x128xf32>
    %257 = vector.broadcast %256 : vector<1x128xf32> to vector<8x128xf32>
    %258 = arith.addf %255, %257 : vector<8x128xf32>
    %259 = arith.index_cast %c5_i32 : i32 to index
    %c0_147 = arith.constant 0 : index
    %c0_148 = arith.constant 0 : index
    %260 = vector.load %arg2[%259, %c0_147, %c0_148] : memref<8x8x128xf32, #tpu.memory_space<vmem>>, vector<1x8x128xf32>
    %261 = vector.shape_cast %260 : vector<1x8x128xf32> to vector<8x128xf32>
    %262 = arith.addf %261, %248 : vector<8x128xf32>
    %263 = arith.negf %262 : vector<8x128xf32>
    %264 = math.exp %263 : vector<8x128xf32>
    %cst_149 = arith.constant 1.000000e+00 : f32
    %265 = vector.broadcast %cst_149 : f32 to vector<8x128xf32>
    %266 = arith.addf %265, %264 : vector<8x128xf32>
    %267 = arith.divf %265, %266 : vector<8x128xf32>
    %268 = arith.index_cast %c5_i32 : i32 to index
    %c0_150 = arith.constant 0 : index
    %c0_151 = arith.constant 0 : index
    %269 = vector.load %arg3[%268, %c0_150, %c0_151] : memref<8x8x128xf32, #tpu.memory_space<vmem>>, vector<1x8x128xf32>
    %270 = vector.shape_cast %269 : vector<1x8x128xf32> to vector<8x128xf32>
    %271 = arith.addf %270, %253 : vector<8x128xf32>
    %272 = arith.negf %271 : vector<8x128xf32>
    %273 = math.exp %272 : vector<8x128xf32>
    %cst_152 = arith.constant 1.000000e+00 : f32
    %274 = vector.broadcast %cst_152 : f32 to vector<8x128xf32>
    %275 = arith.addf %274, %273 : vector<8x128xf32>
    %276 = arith.divf %274, %275 : vector<8x128xf32>
    %277 = arith.index_cast %c5_i32 : i32 to index
    %c0_153 = arith.constant 0 : index
    %c0_154 = arith.constant 0 : index
    %278 = vector.load %arg4[%277, %c0_153, %c0_154] : memref<8x8x128xf32, #tpu.memory_space<vmem>>, vector<1x8x128xf32>
    %279 = vector.shape_cast %278 : vector<1x8x128xf32> to vector<8x128xf32>
    %280 = arith.mulf %267, %258 : vector<8x128xf32>
    %281 = arith.addf %279, %280 : vector<8x128xf32>
    %282 = math.tanh %281 : vector<8x128xf32>
    %cst_155 = arith.constant 1.000000e+00 : f32
    %283 = vector.broadcast %cst_155 : f32 to vector<8x128xf32>
    %284 = arith.subf %283, %276 : vector<8x128xf32>
    %285 = arith.mulf %284, %282 : vector<8x128xf32>
    %286 = arith.mulf %276, %239 : vector<8x128xf32>
    %287 = arith.addf %285, %286 : vector<8x128xf32>
    %288 = arith.index_cast %c5_i32 : i32 to index
    %c0_156 = arith.constant 0 : index
    %c0_157 = arith.constant 0 : index
    %289 = vector.load %arg12[%288, %c0_156, %c0_157] : memref<8x8x128xf32, #tpu.memory_space<vmem>>, vector<1x8x128xf32>
    %290 = vector.shape_cast %289 : vector<1x8x128xf32> to vector<8x128xf32>
    %291 = vector.shape_cast %287 : vector<8x128xf32> to vector<1x8x128xf32>
    tpu.vector_store %arg12[%288, %c0_156, %c0_157], %291 {strides = array<i32>} : memref<8x8x128xf32, #tpu.memory_space<vmem>>, vector<1x8x128xf32>,
    %c6_i32 = arith.constant 6 : i32
    %c0_158 = arith.constant 0 : index
    %c0_159 = arith.constant 0 : index
    %292 = vector.load %arg5[%c0_158, %c0_159] : memref<128x128xf32, #tpu.memory_space<vmem>>, vector<128x128xf32>
    %cst_160 = arith.constant dense<0.000000e+00> : vector<8x128xf32>
    %293 = tpu.matmul %287, %292, %cst_160 {dimension_numbers = #tpu.dot_dimension_numbers<[1], [0], [0], [1], [0, 0, 1, 1], [], []>} : vector<8x128xf32>, vector<128x128xf32>, vector<8x128xf32> -> vector<8x128xf32>
    %c0_161 = arith.constant 0 : index
    %c0_162 = arith.constant 0 : index
    %294 = vector.load %arg8[%c0_161, %c0_162] : memref<1x128xf32, #tpu.memory_space<vmem>>, vector<1x128xf32>
    %295 = vector.broadcast %294 : vector<1x128xf32> to vector<8x128xf32>
    %296 = arith.addf %293, %295 : vector<8x128xf32>
    %c0_163 = arith.constant 0 : index
    %c0_164 = arith.constant 0 : index
    %297 = vector.load %arg6[%c0_163, %c0_164] : memref<128x128xf32, #tpu.memory_space<vmem>>, vector<128x128xf32>
    %cst_165 = arith.constant dense<0.000000e+00> : vector<8x128xf32>
    %298 = tpu.matmul %287, %297, %cst_165 {dimension_numbers = #tpu.dot_dimension_numbers<[1], [0], [0], [1], [0, 0, 1, 1], [], []>} : vector<8x128xf32>, vector<128x128xf32>, vector<8x128xf32> -> vector<8x128xf32>
    %c0_166 = arith.constant 0 : index
    %c0_167 = arith.constant 0 : index
    %299 = vector.load %arg9[%c0_166, %c0_167] : memref<1x128xf32, #tpu.memory_space<vmem>>, vector<1x128xf32>
    %300 = vector.broadcast %299 : vector<1x128xf32> to vector<8x128xf32>
    %301 = arith.addf %298, %300 : vector<8x128xf32>
    %c0_168 = arith.constant 0 : index
    %c0_169 = arith.constant 0 : index
    %302 = vector.load %arg7[%c0_168, %c0_169] : memref<128x128xf32, #tpu.memory_space<vmem>>, vector<128x128xf32>
    %cst_170 = arith.constant dense<0.000000e+00> : vector<8x128xf32>
    %303 = tpu.matmul %287, %302, %cst_170 {dimension_numbers = #tpu.dot_dimension_numbers<[1], [0], [0], [1], [0, 0, 1, 1], [], []>} : vector<8x128xf32>, vector<128x128xf32>, vector<8x128xf32> -> vector<8x128xf32>
    %c0_171 = arith.constant 0 : index
    %c0_172 = arith.constant 0 : index
    %304 = vector.load %arg10[%c0_171, %c0_172] : memref<1x128xf32, #tpu.memory_space<vmem>>, vector<1x128xf32>
    %305 = vector.broadcast %304 : vector<1x128xf32> to vector<8x128xf32>
    %306 = arith.addf %303, %305 : vector<8x128xf32>
    %307 = arith.index_cast %c6_i32 : i32 to index
    %c0_173 = arith.constant 0 : index
    %c0_174 = arith.constant 0 : index
    %308 = vector.load %arg2[%307, %c0_173, %c0_174] : memref<8x8x128xf32, #tpu.memory_space<vmem>>, vector<1x8x128xf32>
    %309 = vector.shape_cast %308 : vector<1x8x128xf32> to vector<8x128xf32>
    %310 = arith.addf %309, %296 : vector<8x128xf32>
    %311 = arith.negf %310 : vector<8x128xf32>
    %312 = math.exp %311 : vector<8x128xf32>
    %cst_175 = arith.constant 1.000000e+00 : f32
    %313 = vector.broadcast %cst_175 : f32 to vector<8x128xf32>
    %314 = arith.addf %313, %312 : vector<8x128xf32>
    %315 = arith.divf %313, %314 : vector<8x128xf32>
    %316 = arith.index_cast %c6_i32 : i32 to index
    %c0_176 = arith.constant 0 : index
    %c0_177 = arith.constant 0 : index
    %317 = vector.load %arg3[%316, %c0_176, %c0_177] : memref<8x8x128xf32, #tpu.memory_space<vmem>>, vector<1x8x128xf32>
    %318 = vector.shape_cast %317 : vector<1x8x128xf32> to vector<8x128xf32>
    %319 = arith.addf %318, %301 : vector<8x128xf32>
    %320 = arith.negf %319 : vector<8x128xf32>
    %321 = math.exp %320 : vector<8x128xf32>
    %cst_178 = arith.constant 1.000000e+00 : f32
    %322 = vector.broadcast %cst_178 : f32 to vector<8x128xf32>
    %323 = arith.addf %322, %321 : vector<8x128xf32>
    %324 = arith.divf %322, %323 : vector<8x128xf32>
    %325 = arith.index_cast %c6_i32 : i32 to index
    %c0_179 = arith.constant 0 : index
    %c0_180 = arith.constant 0 : index
    %326 = vector.load %arg4[%325, %c0_179, %c0_180] : memref<8x8x128xf32, #tpu.memory_space<vmem>>, vector<1x8x128xf32>
    %327 = vector.shape_cast %326 : vector<1x8x128xf32> to vector<8x128xf32>
    %328 = arith.mulf %315, %306 : vector<8x128xf32>
    %329 = arith.addf %327, %328 : vector<8x128xf32>
    %330 = math.tanh %329 : vector<8x128xf32>
    %cst_181 = arith.constant 1.000000e+00 : f32
    %331 = vector.broadcast %cst_181 : f32 to vector<8x128xf32>
    %332 = arith.subf %331, %324 : vector<8x128xf32>
    %333 = arith.mulf %332, %330 : vector<8x128xf32>
    %334 = arith.mulf %324, %287 : vector<8x128xf32>
    %335 = arith.addf %333, %334 : vector<8x128xf32>
    %336 = arith.index_cast %c6_i32 : i32 to index
    %c0_182 = arith.constant 0 : index
    %c0_183 = arith.constant 0 : index
    %337 = vector.load %arg12[%336, %c0_182, %c0_183] : memref<8x8x128xf32, #tpu.memory_space<vmem>>, vector<1x8x128xf32>
    %338 = vector.shape_cast %337 : vector<1x8x128xf32> to vector<8x128xf32>
    %339 = vector.shape_cast %335 : vector<8x128xf32> to vector<1x8x128xf32>
    tpu.vector_store %arg12[%336, %c0_182, %c0_183], %339 {strides = array<i32>} : memref<8x8x128xf32, #tpu.memory_space<vmem>>, vector<1x8x128xf32>,
    %c7_i32 = arith.constant 7 : i32
    %c0_184 = arith.constant 0 : index
    %c0_185 = arith.constant 0 : index
    %340 = vector.load %arg5[%c0_184, %c0_185] : memref<128x128xf32, #tpu.memory_space<vmem>>, vector<128x128xf32>
    %cst_186 = arith.constant dense<0.000000e+00> : vector<8x128xf32>
    %341 = tpu.matmul %335, %340, %cst_186 {dimension_numbers = #tpu.dot_dimension_numbers<[1], [0], [0], [1], [0, 0, 1, 1], [], []>} : vector<8x128xf32>, vector<128x128xf32>, vector<8x128xf32> -> vector<8x128xf32>
    %c0_187 = arith.constant 0 : index
    %c0_188 = arith.constant 0 : index
    %342 = vector.load %arg8[%c0_187, %c0_188] : memref<1x128xf32, #tpu.memory_space<vmem>>, vector<1x128xf32>
    %343 = vector.broadcast %342 : vector<1x128xf32> to vector<8x128xf32>
    %344 = arith.addf %341, %343 : vector<8x128xf32>
    %c0_189 = arith.constant 0 : index
    %c0_190 = arith.constant 0 : index
    %345 = vector.load %arg6[%c0_189, %c0_190] : memref<128x128xf32, #tpu.memory_space<vmem>>, vector<128x128xf32>
    %cst_191 = arith.constant dense<0.000000e+00> : vector<8x128xf32>
    %346 = tpu.matmul %335, %345, %cst_191 {dimension_numbers = #tpu.dot_dimension_numbers<[1], [0], [0], [1], [0, 0, 1, 1], [], []>} : vector<8x128xf32>, vector<128x128xf32>, vector<8x128xf32> -> vector<8x128xf32>
    %c0_192 = arith.constant 0 : index
    %c0_193 = arith.constant 0 : index
    %347 = vector.load %arg9[%c0_192, %c0_193] : memref<1x128xf32, #tpu.memory_space<vmem>>, vector<1x128xf32>
    %348 = vector.broadcast %347 : vector<1x128xf32> to vector<8x128xf32>
    %349 = arith.addf %346, %348 : vector<8x128xf32>
    %c0_194 = arith.constant 0 : index
    %c0_195 = arith.constant 0 : index
    %350 = vector.load %arg7[%c0_194, %c0_195] : memref<128x128xf32, #tpu.memory_space<vmem>>, vector<128x128xf32>
    %cst_196 = arith.constant dense<0.000000e+00> : vector<8x128xf32>
    %351 = tpu.matmul %335, %350, %cst_196 {dimension_numbers = #tpu.dot_dimension_numbers<[1], [0], [0], [1], [0, 0, 1, 1], [], []>} : vector<8x128xf32>, vector<128x128xf32>, vector<8x128xf32> -> vector<8x128xf32>
    %c0_197 = arith.constant 0 : index
    %c0_198 = arith.constant 0 : index
    %352 = vector.load %arg10[%c0_197, %c0_198] : memref<1x128xf32, #tpu.memory_space<vmem>>, vector<1x128xf32>
    %353 = vector.broadcast %352 : vector<1x128xf32> to vector<8x128xf32>
    %354 = arith.addf %351, %353 : vector<8x128xf32>
    %355 = arith.index_cast %c7_i32 : i32 to index
    %c0_199 = arith.constant 0 : index
    %c0_200 = arith.constant 0 : index
    %356 = vector.load %arg2[%355, %c0_199, %c0_200] : memref<8x8x128xf32, #tpu.memory_space<vmem>>, vector<1x8x128xf32>
    %357 = vector.shape_cast %356 : vector<1x8x128xf32> to vector<8x128xf32>
    %358 = arith.addf %357, %344 : vector<8x128xf32>
    %359 = arith.negf %358 : vector<8x128xf32>
    %360 = math.exp %359 : vector<8x128xf32>
    %cst_201 = arith.constant 1.000000e+00 : f32
    %361 = vector.broadcast %cst_201 : f32 to vector<8x128xf32>
    %362 = arith.addf %361, %360 : vector<8x128xf32>
    %363 = arith.divf %361, %362 : vector<8x128xf32>
    %364 = arith.index_cast %c7_i32 : i32 to index
    %c0_202 = arith.constant 0 : index
    %c0_203 = arith.constant 0 : index
    %365 = vector.load %arg3[%364, %c0_202, %c0_203] : memref<8x8x128xf32, #tpu.memory_space<vmem>>, vector<1x8x128xf32>
    %366 = vector.shape_cast %365 : vector<1x8x128xf32> to vector<8x128xf32>
    %367 = arith.addf %366, %349 : vector<8x128xf32>
    %368 = arith.negf %367 : vector<8x128xf32>
    %369 = math.exp %368 : vector<8x128xf32>
    %cst_204 = arith.constant 1.000000e+00 : f32
    %370 = vector.broadcast %cst_204 : f32 to vector<8x128xf32>
    %371 = arith.addf %370, %369 : vector<8x128xf32>
    %372 = arith.divf %370, %371 : vector<8x128xf32>
    %373 = arith.index_cast %c7_i32 : i32 to index
    %c0_205 = arith.constant 0 : index
    %c0_206 = arith.constant 0 : index
    %374 = vector.load %arg4[%373, %c0_205, %c0_206] : memref<8x8x128xf32, #tpu.memory_space<vmem>>, vector<1x8x128xf32>
    %375 = vector.shape_cast %374 : vector<1x8x128xf32> to vector<8x128xf32>
    %376 = arith.mulf %363, %354 : vector<8x128xf32>
    %377 = arith.addf %375, %376 : vector<8x128xf32>
    %378 = math.tanh %377 : vector<8x128xf32>
    %cst_207 = arith.constant 1.000000e+00 : f32
    %379 = vector.broadcast %cst_207 : f32 to vector<8x128xf32>
    %380 = arith.subf %379, %372 : vector<8x128xf32>
    %381 = arith.mulf %380, %378 : vector<8x128xf32>
    %382 = arith.mulf %372, %335 : vector<8x128xf32>
    %383 = arith.addf %381, %382 : vector<8x128xf32>
    %384 = arith.index_cast %c7_i32 : i32 to index
    %c0_208 = arith.constant 0 : index
    %c0_209 = arith.constant 0 : index
    %385 = vector.load %arg12[%384, %c0_208, %c0_209] : memref<8x8x128xf32, #tpu.memory_space<vmem>>, vector<1x8x128xf32>
    %386 = vector.shape_cast %385 : vector<1x8x128xf32> to vector<8x128xf32>
    %387 = vector.shape_cast %383 : vector<8x128xf32> to vector<1x8x128xf32>
    tpu.vector_store %arg12[%384, %c0_208, %c0_209], %387 {strides = array<i32>} : memref<8x8x128xf32, #tpu.memory_space<vmem>>, vector<1x8x128xf32>,
    %c8_i32 = arith.constant 8 : i32
    %c0_210 = arith.constant 0 : index
    %c0_211 = arith.constant 0 : index
    %388 = vector.load %arg13[%c0_210, %c0_211] : memref<8x128xf32, #tpu.memory_space<vmem>>, vector<8x128xf32>
    tpu.vector_store %arg13[%c0_210, %c0_211], %383 {strides = array<i32>} : memref<8x128xf32, #tpu.memory_space<vmem>>, vector<8x128xf32>,
    return
  }
  func.func @transform_0(%arg0: i32, %arg1: i32) -> (i32, i32, i32) {
    %c0_i32 = arith.constant 0 : i32
    %c0_i32_0 = arith.constant 0 : i32
    return %arg1, %arg0, %c0_i32 : i32, i32, i32
  }
  func.func @transform_1(%arg0: i32, %arg1: i32) -> (i32, i32, i32) {
    %c0_i32 = arith.constant 0 : i32
    %c0_i32_0 = arith.constant 0 : i32
    return %arg1, %arg0, %c0_i32 : i32, i32, i32
  }
  func.func @transform_2(%arg0: i32, %arg1: i32) -> (i32, i32, i32) {
    %c0_i32 = arith.constant 0 : i32
    %c0_i32_0 = arith.constant 0 : i32
    return %arg1, %arg0, %c0_i32 : i32, i32, i32
  }
  func.func @transform_3(%arg0: i32, %arg1: i32) -> (i32, i32) {
    %c0_i32 = arith.constant 0 : i32
    %c0_i32_0 = arith.constant 0 : i32
    %c0_i32_1 = arith.constant 0 : i32
    return %c0_i32, %c0_i32_0 : i32, i32
  }
  func.func @transform_4(%arg0: i32, %arg1: i32) -> (i32, i32) {
    %c0_i32 = arith.constant 0 : i32
    %c0_i32_0 = arith.constant 0 : i32
    %c0_i32_1 = arith.constant 0 : i32
    return %c0_i32, %c0_i32_0 : i32, i32
  }
  func.func @transform_5(%arg0: i32, %arg1: i32) -> (i32, i32) {
    %c0_i32 = arith.constant 0 : i32
    %c0_i32_0 = arith.constant 0 : i32
    %c0_i32_1 = arith.constant 0 : i32
    return %c0_i32, %c0_i32_0 : i32, i32
  }
  func.func @transform_6(%arg0: i32, %arg1: i32) -> (i32, i32) {
    %c0_i32 = arith.constant 0 : i32
    %c0_i32_0 = arith.constant 0 : i32
    %c0_i32_1 = arith.constant 0 : i32
    return %c0_i32, %c0_i32_0 : i32, i32
  }
  func.func @transform_7(%arg0: i32, %arg1: i32) -> (i32, i32) {
    %c0_i32 = arith.constant 0 : i32
    %c0_i32_0 = arith.constant 0 : i32
    %c0_i32_1 = arith.constant 0 : i32
    return %c0_i32, %c0_i32_0 : i32, i32
  }
  func.func @transform_8(%arg0: i32, %arg1: i32) -> (i32, i32) {
    %c0_i32 = arith.constant 0 : i32
    %c0_i32_0 = arith.constant 0 : i32
    %c0_i32_1 = arith.constant 0 : i32
    return %c0_i32, %c0_i32_0 : i32, i32
  }
  func.func @transform_9(%arg0: i32, %arg1: i32) -> (i32, i32) {
    %c0_i32 = arith.constant 0 : i32
    %c0_i32_0 = arith.constant 0 : i32
    return %arg0, %c0_i32 : i32, i32
  }
  func.func @transform_10(%arg0: i32, %arg1: i32) -> (i32, i32, i32) {
    %c0_i32 = arith.constant 0 : i32
    %c0_i32_0 = arith.constant 0 : i32
    return %arg1, %arg0, %c0_i32 : i32, i32, i32
  }
}

</mosaic_0001>

<bundles_post_ra>
// kernel: tpu_custom_call.1
= control target key start
LH: loop header
LB: loop body
LE: loop exit
PB: predicated region body
PF: predicated region fallthrough
CT: control target
= control target key end

     0   :  { %15 = vsyncpa [#allocation4], 0  ;;  %s5552_s0 = inlined_call_operand.hbm [shape: f32[8,8,128], index: 0, kind: input, shape index: {}]   ;;  %s5553_s1 = inlined_call_operand.hbm [shape: f32[8,8,128], index: 1, kind: input, shape index: {}]   ;;  %s5554_s2 = inlined_call_operand.hbm [shape: f32[8,8,128], index: 2, kind: input, shape index: {}]   ;;  %s5555_s3 = inlined_call_operand.hbm [shape: f32[128,128], index: 3, kind: input, shape index: {}]   ;;  %s5556_s4 = inlined_call_operand.hbm [shape: f32[128,128], index: 4, kind: input, shape index: {}]   ;;  %s5557_s5 = inlined_call_operand.hbm [shape: f32[128,128], index: 5, kind: input, shape index: {}]   ;;  %s5558_s6 = inlined_call_operand.vmem [shape: f32[1,128], index: 6, kind: input, shape index: {}]   ;;  %s5559_s7 = inlined_call_operand.vmem [shape: f32[1,128], index: 7, kind: input, shape index: {}]   ;;  %s5560_s8 = inlined_call_operand.vmem [shape: f32[1,128], index: 8, kind: input, shape index: {}]   ;;  %s5561_s9 = inlined_call_operand.vmem [shape: f32[8,128], index: 9, kind: input, shape index: {}]   ;;  %s5562_s10 = inlined_call_operand.hbm [shape: f32[8,8,128], index: 10, kind: output, shape index: {}]  }
   0x1   :  { %16 = vsyncpa [#allocation7], 0 }
   0x2   :  { %17 = vsyncpa [#allocation10], 0 }
   0x3   :  { %18 = vsyncpa [#allocation13], 0 }
   0x4   :  { %19 = vsyncpa [#allocation5], 0  ;;  %s4726_s13 = smov [#allocation6]   ;;  %s4727_s15 = smov [#allocation9]  }
   0x5   :  { %s37_s14 = sshll.u32 %s4726_s13, 4  ;;  %s61_s16 = sshll.u32 %s4727_s15, 4  ;;  %s38_s14 = int_to_ptr.vmem [resolvable:$true] %s37_s14  ;;  %s4793_s16 = int_to_ptr.vmem [resolvable:$true] %s61_s16 }
   0x6   :  { %s4562_s19 = scalar_lea.hbm %s5553_s1, 1024 }
   0x7   :  { %p4563_p0 = scmp.ne.s32.totalorder %s5553_s1, %s4562_s19  ;;  %p4566_p1 = scmp.lt.u32.totalorder %s4562_s19, %s5553_s1 }
   0x9   :  { %p4568_p2 = pnand %p4566_p1, %p4563_p0 }
   0xb   :  { %4571 = shalt.err (!%p4568_p2)
}
   0xc   :  { %s4572_s24 = scalar_lea.vmem %s38_s14, 1024  ;;  %p4577_p4 = scmp.lt.s32.totalorder %s38_s14, %s38_s14 }
   0xd   :  { %p4573_p3 = scmp.ne.s32.totalorder %s38_s14, %s4572_s24  ;;  %p4578_p5 = scmp.lt.s32.totalorder %s4572_s24, %s4572_s24 }
   0xf   :  { %p4579_p6 = por %p4578_p5, %p4577_p4 }
  0x11   :  { %p4580_p7 = pnand %p4579_p6, %p4573_p3 }
  0x13   :  { %4583 = shalt.err (!%p4580_p7)
}
  0x14   :  { %s4728_s25 = smov 128   ;;  %s4729_s26 = smov 8  }
  0x15   :  { %43 = dma.hbm_to_vmem [thread:$0]  %s5553_s1, 1024, %s38_s14, [#allocation7], %s4728_s25, %s4728_s25, %s4729_s26  }
  0x16   :  { %s4584_s11 = scalar_lea.hbm %s5555_s3, 2048 }
  0x17   :  { %p4585_p8 = scmp.ne.s32.totalorder %s5555_s3, %s4584_s11  ;;  %p4588_p9 = scmp.lt.u32.totalorder %s4584_s11, %s5555_s3 }
  0x19   :  { %p4590_p10 = pnand %p4588_p9, %p4585_p8 }
  0x1b   :  { %4593 = shalt.err (!%p4590_p10)
}
  0x1c   :  { %s4594_s18 = scalar_lea.vmem %s4793_s16, 2048  ;;  %p4599_p12 = scmp.lt.s32.totalorder %s4793_s16, %s4793_s16 }
  0x1d   :  { %p4595_p11 = scmp.ne.s32.totalorder %s4793_s16, %s4594_s18  ;;  %p4600_p13 = scmp.lt.s32.totalorder %s4594_s18, %s4594_s18 }
  0x1f   :  { %p4601_p0 = por %p4600_p13, %p4599_p12 }
  0x21   :  { %p4602_p1 = pnand %p4601_p0, %p4595_p11 }
  0x23   :  { %4605 = shalt.err (!%p4602_p1)
}
  0x24   :  { %67 = dma.hbm_to_vmem [thread:$0]  %s5555_s3, 2048, %s4793_s16, [#allocation10], %s4728_s25, %s4728_s25, %s4729_s26  }
  0x25   :  { %s4730_s19 = smov [#allocation3]   ;;  %s4731_s21 = smov [#allocation8]  }
  0x26   :  { %s25_s20 = sshll.u32 %s4730_s19, 4  ;;  %s49_s22 = sshll.u32 %s4731_s21, 4  ;;  %s26_s20 = int_to_ptr.vmem [resolvable:$true] %s25_s20  ;;  %s4830_s22 = int_to_ptr.vmem [resolvable:$true] %s49_s22 }
  0x27   :  { %s4606_s27 = scalar_lea.hbm %s5552_s0, 1024 }
  0x28   :  { %p4607_p2 = scmp.ne.s32.totalorder %s5552_s0, %s4606_s27  ;;  %p4610_p3 = scmp.lt.u32.totalorder %s4606_s27, %s5552_s0 }
  0x2a   :  { %p4612_p4 = pnand %p4610_p3, %p4607_p2 }
  0x2c   :  { %4615 = shalt.err (!%p4612_p4)
}
  0x2d   :  { %s4616_s3 = scalar_lea.vmem %s26_s20, 1024  ;;  %p4621_p6 = scmp.lt.s32.totalorder %s26_s20, %s26_s20 }
  0x2e   :  { %p4617_p5 = scmp.ne.s32.totalorder %s26_s20, %s4616_s3  ;;  %p4622_p7 = scmp.lt.s32.totalorder %s4616_s3, %s4616_s3 }
  0x30   :  { %p4623_p8 = por %p4622_p7, %p4621_p6 }
  0x32   :  { %p4624_p9 = pnand %p4623_p8, %p4617_p5 }
  0x34   :  { %4627 = shalt.err (!%p4624_p9)
}
  0x35   :  { %31 = dma.hbm_to_vmem [thread:$0]  %s5552_s0, 1024, %s26_s20, [#allocation4], %s4728_s25, %s4728_s25, %s4729_s26  }
  0x36   :  { %s4628_s17 = scalar_lea.hbm %s5554_s2, 1024 }
  0x37   :  { %p4629_p10 = scmp.ne.s32.totalorder %s5554_s2, %s4628_s17  ;;  %p4632_p11 = scmp.lt.u32.totalorder %s4628_s17, %s5554_s2 }
  0x39   :  { %p4634_p12 = pnand %p4632_p11, %p4629_p10 }
  0x3b   :  { %4637 = shalt.err (!%p4634_p12)
}
  0x3c   :  { %s4638_s21 = scalar_lea.vmem %s4830_s22, 1024  ;;  %p4643_p0 = scmp.lt.s32.totalorder %s4830_s22, %s4830_s22 }
  0x3d   :  { %p4639_p13 = scmp.ne.s32.totalorder %s4830_s22, %s4638_s21  ;;  %p4644_p1 = scmp.lt.s32.totalorder %s4638_s21, %s4638_s21 }
  0x3f   :  { %p4645_p2 = por %p4644_p1, %p4643_p0 }
  0x41   :  { %p4646_p3 = pnand %p4645_p2, %p4639_p13 }
  0x43   :  { %4649 = shalt.err (!%p4646_p3)
}
  0x44   :  { %55 = dma.hbm_to_vmem [thread:$0]  %s5554_s2, 1024, %s4830_s22, [#allocation7], %s4728_s25, %s4728_s25, %s4729_s26  }
  0x45   :  { %s4732_s23 = smov [#allocation11]   ;;  %s4733_s27 = smov [#allocation12]  }
  0x46   :  { %s73_s24 = sshll.u32 %s4732_s23, 4  ;;  %s85_s28 = sshll.u32 %s4733_s27, 4  ;;  %s74_s24 = int_to_ptr.vmem [resolvable:$true] %s73_s24  ;;  %s4867_s28 = int_to_ptr.vmem [resolvable:$true] %s85_s28 }
  0x47   :  { %s4650_s11 = scalar_lea.hbm %s5556_s4, 2048 }
  0x48   :  { %p4651_p4 = scmp.ne.s32.totalorder %s5556_s4, %s4650_s11  ;;  %p4654_p5 = scmp.lt.u32.totalorder %s4650_s11, %s5556_s4 }
  0x4a   :  { %p4656_p6 = pnand %p4654_p5, %p4651_p4 }
  0x4c   :  { %4659 = shalt.err (!%p4656_p6)
}
  0x4d   :  { %s4660_s2 = scalar_lea.vmem %s74_s24, 2048  ;;  %p4665_p8 = scmp.lt.s32.totalorder %s74_s24, %s74_s24 }
  0x4e   :  { %p4661_p7 = scmp.ne.s32.totalorder %s74_s24, %s4660_s2  ;;  %p4666_p9 = scmp.lt.s32.totalorder %s4660_s2, %s4660_s2 }
  0x50   :  { %p4667_p10 = por %p4666_p9, %p4665_p8 }
  0x52   :  { %p4668_p11 = pnand %p4667_p10, %p4661_p7 }
  0x54   :  { %4671 = shalt.err (!%p4668_p11)
}
  0x55   :  { %79 = dma.hbm_to_vmem [thread:$0]  %s5556_s4, 2048, %s74_s24, [#allocation10], %s4728_s25, %s4728_s25, %s4729_s26  }
  0x56   :  { %s4672_s1 = scalar_lea.hbm %s5557_s5, 2048 }
  0x57   :  { %p4673_p12 = scmp.ne.s32.totalorder %s5557_s5, %s4672_s1  ;;  %p4676_p13 = scmp.lt.u32.totalorder %s4672_s1, %s5557_s5 }
  0x59   :  { %p4678_p0 = pnand %p4676_p13, %p4673_p12 }
  0x5b   :  { %4681 = shalt.err (!%p4678_p0)
}
  0x5c   :  { %s4682_s20 = scalar_lea.vmem %s4867_s28, 2048  ;;  %p4687_p2 = scmp.lt.s32.totalorder %s4867_s28, %s4867_s28 }
  0x5d   :  { %p4683_p1 = scmp.ne.s32.totalorder %s4867_s28, %s4682_s20  ;;  %p4688_p3 = scmp.lt.s32.totalorder %s4682_s20, %s4682_s20 }
  0x5f   :  { %p4689_p4 = por %p4688_p3, %p4687_p2 }
  0x61   :  { %p4690_p5 = pnand %p4689_p4, %p4683_p1 }
  0x63   :  { %4693 = shalt.err (!%p4690_p5)
}
  0x64   :  { %91 = dma.hbm_to_vmem [thread:$0]  %s5557_s5, 2048, %s4867_s28, [#allocation13], %s4728_s25, %s4728_s25, %s4729_s26  }
  0x65   :  { %4716 = dma.done.wait [#allocation4], 1024  }
  0x66   :  { %4717 = vsyncadd [#allocation4], 4294966272 }
  0x67   :  { %4718 = dma.done.wait [#allocation7], 2048  }
  0x68   :  { %4719 = vsyncadd [#allocation7], 4294965248 }
  0x69   :  { %4720 = dma.done.wait [#allocation10], 4096  }
  0x6a   :  { %4721 = vsyncadd [#allocation10], 4294963200 }
  0x6b   :  { %4722 = dma.done.wait [#allocation13], 2048  }
  0x6c   :  { %4723 = vsyncadd [#allocation13], 4294965248  ;;  %v4734_v0 = vmov 0.0|0.0   ;;  %vm4735_vm0 = vmmov 0   ;;  %v4736_v1 = vmov 0.0   ;;  %v125_v2 = vld [vmem:[#allocation9] sm:$0xff] }
  0x6d   :  { %3894 = vmatprep.subr.bf16.mxu0 %v4734_v0  ;;  %3918 = vmatprep.subr.bf16.mxu1 %v4734_v0  ;;  %v126_v3 = vld [vmem:[#allocation9 + $0x8] sm:$0xff]  ;;  %v127_v4 = vld [vmem:[#allocation9 + $0x10] sm:$0xff]  ;;  %v128_v6 = vld [vmem:[#allocation9 + $0x18] sm:$0xff] }
  0x6e   :  { %3086 = vmatprep.mubr.msk.f32.mxu0 %vm4735_vm0, %v4736_v1  ;;  %3121 = vmatprep.mubr.msk.f32.mxu1 %vm4735_vm0, %v4736_v1  ;;  %v4910_v5 = vpack.c.bf16 %v126_v3, %v125_v2  ;;  %v4913_v7 = vpack.c.bf16 %v128_v6, %v127_v4  ;;  %v218_v8 = vld [vmem:[#allocation11] sm:$0xff]  ;;  %v219_v9 = vld [vmem:[#allocation11 + $0x8] sm:$0xff]  ;;  %v220_v13 = vld [vmem:[#allocation11 + $0x10] sm:$0xff] }
  0x6f   :  { %v129_v10 = vld [vmem:[#allocation9 + $0x20] sm:$0xff]  ;;  %v130_v11 = vld [vmem:[#allocation9 + $0x28] sm:$0xff]  ;;  %v4916_v12 = vpack.c.bf16 %v219_v9, %v218_v8  ;;  %v221_v14 = vld [vmem:[#allocation11 + $0x18] sm:$0xff] }
  0x70   :  { %3896 = vmatpush3.bf16.msra.mxu0 %v4910_v5  ;;  %v4919_v15 = vpack.c.bf16 %v221_v14, %v220_v13  ;;  %v4922_v16 = vpack.c.bf16 %v130_v11, %v129_v10  ;;  %v222_v17 = vld [vmem:[#allocation11 + $0x20] sm:$0xff]  ;;  %v223_v18 = vld [vmem:[#allocation11 + $0x28] sm:$0xff]  ;;  %v131_v19 = vld [vmem:[#allocation9 + $0x30] sm:$0xff] }
  0x71   :  { %3897 = vmatprep.subr.bf16.mxu0 %v4734_v0  ;;  %3920 = vmatpush3.bf16.msra.mxu1 %v4916_v12  ;;  %v132_v20 = vld [vmem:[#allocation9 + $0x38] sm:$0xff]  ;;  %v4927_v21 = vpack.c.bf16 %v223_v18, %v222_v17  ;;  %v224_v23 = vld [vmem:[#allocation11 + $0x30] sm:$0xff]  ;;  %v133_v25 = vld [vmem:[#allocation9 + $0x40] sm:$0xff] }
  0x72   :  { %3921 = vmatprep.subr.bf16.mxu1 %v4734_v0  ;;  %v4930_v22 = vpack.c.bf16 %v132_v20, %v131_v19  ;;  %v225_v24 = vld [vmem:[#allocation11 + $0x38] sm:$0xff]  ;;  %v134_v26 = vld [vmem:[#allocation9 + $0x48] sm:$0xff]  ;;  %v226_v29 = vld [vmem:[#allocation11 + $0x40] sm:$0xff] }
  0x73   :  { %v4935_v27 = vpack.c.bf16 %v225_v24, %v224_v23  ;;  %v4938_v28 = vpack.c.bf16 %v134_v26, %v133_v25  ;;  %v227_v30 = vld [vmem:[#allocation11 + $0x48] sm:$0xff]  ;;  %v135_v31 = vld [vmem:[#allocation9 + $0x50] sm:$0xff]  ;;  %v136_v32 = vld [vmem:[#allocation9 + $0x58] sm:$0xff] }
  0x74   :  { %3899 = vmatpush3.bf16.msra.mxu0 %v4913_v7  ;;  %v4943_v33 = vpack.c.bf16 %v227_v30, %v226_v29  ;;  %v4946_v34 = vpack.c.bf16 %v136_v32, %v135_v31  ;;  %v228_v35 = vld [vmem:[#allocation11 + $0x50] sm:$0xff]  ;;  %v229_v36 = vld [vmem:[#allocation11 + $0x58] sm:$0xff]  ;;  %v137_v37 = vld [vmem:[#allocation9 + $0x60] sm:$0xff] }
  0x75   :  { %3900 = vmatprep.subr.bf16.mxu0 %v4734_v0  ;;  %3923 = vmatpush3.bf16.msra.mxu1 %v4919_v15  ;;  %v138_v38 = vld [vmem:[#allocation9 + $0x68] sm:$0xff]  ;;  %v4951_v39 = vpack.c.bf16 %v229_v36, %v228_v35  ;;  %v230_v41 = vld [vmem:[#allocation11 + $0x60] sm:$0xff]  ;;  %v139_v43 = vld [vmem:[#allocation9 + $0x70] sm:$0xff] }
  0x76   :  { %3924 = vmatprep.subr.bf16.mxu1 %v4734_v0  ;;  %v4954_v40 = vpack.c.bf16 %v138_v38, %v137_v37  ;;  %v231_v42 = vld [vmem:[#allocation11 + $0x68] sm:$0xff]  ;;  %v140_v44 = vld [vmem:[#allocation9 + $0x78] sm:$0xff]  ;;  %v232_v47 = vld [vmem:[#allocation11 + $0x70] sm:$0xff] }
  0x77   :  { %v4959_v45 = vpack.c.bf16 %v231_v42, %v230_v41  ;;  %v4962_v46 = vpack.c.bf16 %v140_v44, %v139_v43  ;;  %v233_v48 = vld [vmem:[#allocation11 + $0x78] sm:$0xff]  ;;  %v311_v49 = vld [vmem:[#allocation12] sm:$0xff]  ;;  %v312_v50 = vld [vmem:[#allocation12 + $0x8] sm:$0xff] }
  0x78   :  { %3902 = vmatpush3.bf16.msra.mxu0 %v4922_v16  ;;  %v4967_v51 = vpack.c.bf16 %v233_v48, %v232_v47  ;;  %v4973_v52 = vld [vmem:[%s5561_s9] sm:$0xff]  ;;  %v4975_v53 = vpack.c.bf16 %v312_v50, %v311_v49  ;;  %v313_v54 = vld [vmem:[#allocation12 + $0x10] sm:$0xff]  ;;  %v314_v55 = vld [vmem:[#allocation12 + $0x18] sm:$0xff] }
  0x79   :  { %3903 = vmatprep.subr.bf16.mxu0 %v4734_v0  ;;  %3926 = vmatpush3.bf16.msra.mxu1 %v4927_v21  ;;  %v4982_v56 = vpack.c.bf16 %v314_v55, %v313_v54  ;;  %v315_v57 = vld [vmem:[#allocation12 + $0x20] sm:$0xff]  ;;  %v316_v58 = vld [vmem:[#allocation12 + $0x28] sm:$0xff]  ;;  %v317_v60 = vld [vmem:[#allocation12 + $0x30] sm:$0xff] }
  0x7a   :  { %3927 = vmatprep.subr.bf16.mxu1 %v4734_v0  ;;  %v4993_v59 = vpack.c.bf16 %v316_v58, %v315_v57  ;;  %v318_v61 = vld [vmem:[#allocation12 + $0x38] sm:$0xff]  ;;  %v319_v63 = vld [vmem:[#allocation12 + $0x40] sm:$0xff]  ;;  %v320_v2 = vld [vmem:[#allocation12 + $0x48] sm:$0xff] }
  0x7b   :  { %v4999_v62 = vpack.c.bf16 %v318_v61, %v317_v60  ;;  %v5005_v3 = vpack.c.bf16 %v320_v2, %v319_v63  ;;  %v321_v4 = vld [vmem:[#allocation12 + $0x50] sm:$0xff]  ;;  %v322_v6 = vld [vmem:[#allocation12 + $0x58] sm:$0xff]  ;;  %v323_v9 = vld [vmem:[#allocation12 + $0x60] sm:$0xff] }
  0x7c   :  { %3905 = vmatpush3.bf16.msra.mxu0 %v4930_v22  ;;  %v5011_v8 = vpack.c.bf16 %v322_v6, %v321_v4  ;;  %v324_v10 = vld [vmem:[#allocation12 + $0x68] sm:$0xff]  ;;  %v325_v13 = vld [vmem:[#allocation12 + $0x70] sm:$0xff]  ;;  %v326_v14 = vld [vmem:[#allocation12 + $0x78] sm:$0xff] }
  0x7d   :  { %3906 = vmatprep.subr.bf16.mxu0 %v4734_v0  ;;  %3929 = vmatpush3.bf16.msra.mxu1 %v4935_v27  ;;  %v5017_v11 = vpack.c.bf16 %v324_v10, %v323_v9  ;;  %v5023_v17 = vpack.c.bf16 %v326_v14, %v325_v13  ;;  %v5055_v18 = vld [vmem:[%s5558_s6] ss:$0 sm:$0xff]  ;;  %v709_v6 = vld [vmem:[#allocation3 + $0x8] sm:$0xff] }
  0x7e   :  { %3930 = vmatprep.subr.bf16.mxu1 %v4734_v0  ;;  %v404_v20 = vld [vmem:[#allocation3] sm:$0xff] }
  0x7f   :  { %v5061_v25 = vld [vmem:[%s5559_s7] ss:$0 sm:$0xff] }
  0x80   :  { %3908 = vmatpush3.bf16.msra.mxu0 %v4938_v28  ;;  %v412_v35 = vld [vmem:[#allocation6] sm:$0xff] }
  0x81   :  { %3909 = vmatprep.subr.bf16.mxu0 %v4734_v0  ;;  %3932 = vmatpush3.bf16.msra.mxu1 %v4943_v33  ;;  %v5067_v44 = vld [vmem:[%s5560_s8] ss:$0 sm:$0xff] }
  0x82   :  { %3933 = vmatprep.subr.bf16.mxu1 %v4734_v0  ;;  %v420_v54 = vld [vmem:[#allocation8] sm:$0xff] }
  0x84   :  { %3911 = vmatpush3.bf16.msra.mxu0 %v4946_v34 }
  0x85   :  { %3912 = vmatprep.subr.bf16.mxu0 %v4734_v0  ;;  %3935 = vmatpush3.bf16.msra.mxu1 %v4951_v39 }
  0x86   :  { %3936 = vmatprep.subr.bf16.mxu1 %v4734_v0 }
  0x88   :  { %3914 = vmatpush3.bf16.msra.mxu0 %v4954_v40 }
  0x89   :  { %3915 = vmatprep.subr.bf16.mxu0 %v4734_v0  ;;  %3938 = vmatpush3.bf16.msra.mxu1 %v4959_v45 }
  0x8a   :  { %3939 = vmatprep.subr.bf16.mxu1 %v4734_v0 }
  0x8c   :  { %3917 = vmatpush3.bf16.msra.mxu0 %v4962_v46 }
  0x8d   :  { %3942 = vmatprep.subr.bf16.mxu0 %v4734_v0  ;;  %3941 = vmatpush3.bf16.msra.mxu1 %v4967_v51 }
  0x8e   :  { %3966 = vmatprep.subr.bf16.mxu1 %v4734_v0 }
  0x8f   :  { %3087 = vmatmul.mubr.f32.vlgmr.msra.gmra.mrb[0].mxu0 %v4973_v52 }
  0x90   :  { %3944 = vmatpush3.bf16.msra.mxu0 %v4975_v53  ;;  %3156 = vmatprep.mubr.msk.f32.mxu0 %vm4735_vm0, %v4736_v1 }
  0x91   :  { %3945 = vmatprep.subr.bf16.mxu0 %v4734_v0  ;;  %3122 = vmatmul.mubr.f32.vlgmr.msra.gmra.mrb[0].mxu1 %v4973_v52 }
  0x92   :  { %3968 = vmatpush3.bf16.msra.mxu1 %v4910_v5  ;;  %3191 = vmatprep.mubr.msk.f32.mxu1 %vm4735_vm0, %v4736_v1 }
  0x93   :  { %3969 = vmatprep.subr.bf16.mxu1 %v4734_v0 }
  0x94   :  { %3947 = vmatpush3.bf16.msra.mxu0 %v4982_v56 }
  0x95   :  { %3948 = vmatprep.subr.bf16.mxu0 %v4734_v0 }
  0x96   :  { %3971 = vmatpush3.bf16.msra.mxu1 %v4913_v7 }
  0x97   :  { %3972 = vmatprep.subr.bf16.mxu1 %v4734_v0 }
  0x98   :  { %3950 = vmatpush3.bf16.msra.mxu0 %v4993_v59 }
  0x99   :  { %3951 = vmatprep.subr.bf16.mxu0 %v4734_v0 }
  0x9a   :  { %3974 = vmatpush3.bf16.msra.mxu1 %v4922_v16 }
  0x9b   :  { %3975 = vmatprep.subr.bf16.mxu1 %v4734_v0 }
  0x9c   :  { %3953 = vmatpush3.bf16.msra.mxu0 %v4999_v62 }
  0x9d   :  { %3954 = vmatprep.subr.bf16.mxu0 %v4734_v0 }
  0x9e   :  { %3977 = vmatpush3.bf16.msra.mxu1 %v4930_v22 }
  0x9f   :  { %3978 = vmatprep.subr.bf16.mxu1 %v4734_v0 }
  0xa0   :  { %3956 = vmatpush3.bf16.msra.mxu0 %v5005_v3 }
  0xa1   :  { %3957 = vmatprep.subr.bf16.mxu0 %v4734_v0 }
  0xa2   :  { %3980 = vmatpush3.bf16.msra.mxu1 %v4938_v28 }
  0xa3   :  { %3981 = vmatprep.subr.bf16.mxu1 %v4734_v0 }
  0xa4   :  { %3959 = vmatpush3.bf16.msra.mxu0 %v5011_v8 }
  0xa5   :  { %3960 = vmatprep.subr.bf16.mxu0 %v4734_v0 }
  0xa6   :  { %3983 = vmatpush3.bf16.msra.mxu1 %v4946_v34 }
  0xa7   :  { %3984 = vmatprep.subr.bf16.mxu1 %v4734_v0 }
  0xa8   :  { %3962 = vmatpush3.bf16.msra.mxu0 %v5017_v11 }
  0xa9   :  { %3963 = vmatprep.subr.bf16.mxu0 %v4734_v0 }
  0xaa   :  { %3986 = vmatpush3.bf16.msra.mxu1 %v4954_v40 }
  0xab   :  { %3987 = vmatprep.subr.bf16.mxu1 %v4734_v0 }
  0xac   :  { %3965 = vmatpush3.bf16.msra.mxu0 %v5023_v17 }
  0xad   :  { %3990 = vmatprep.subr.bf16.mxu0 %v4734_v0 }
  0xae   :  { %3989 = vmatpush3.bf16.msra.mxu1 %v4962_v46 }
  0xaf   :  { %3157 = vmatmul.mubr.f32.vlgmr.msra.gmra.mrb[2].mxu0 %v4973_v52  ;;  %4014 = vmatprep.subr.bf16.mxu1 %v4734_v0 }
  0xb0   :  { %3992 = vmatpush3.bf16.msra.mxu0 %v4916_v12  ;;  %3226 = vmatprep.mubr.msk.f32.mxu0 %vm4735_vm0, %v4736_v1 }
  0xb1   :  { %3993 = vmatprep.subr.bf16.mxu0 %v4734_v0 }
  0xb4   :  { %3995 = vmatpush3.bf16.msra.mxu0 %v4919_v15 }
  0xb5   :  { %3996 = vmatprep.subr.bf16.mxu0 %v4734_v0 }
  0xb8   :  { %3998 = vmatpush3.bf16.msra.mxu0 %v4927_v21 }
  0xb9   :  { %3999 = vmatprep.subr.bf16.mxu0 %v4734_v0 }
  0xbc   :  { %4001 = vmatpush3.bf16.msra.mxu0 %v4935_v27 }
  0xbd   :  { %4002 = vmatprep.subr.bf16.mxu0 %v4734_v0 }
  0xc0   :  { %4004 = vmatpush3.bf16.msra.mxu0 %v4943_v33 }
  0xc1   :  { %4005 = vmatprep.subr.bf16.mxu0 %v4734_v0 }
  0xc4   :  { %4007 = vmatpush3.bf16.msra.mxu0 %v4951_v39 }
  0xc5   :  { %4008 = vmatprep.subr.bf16.mxu0 %v4734_v0 }
  0xc8   :  { %4010 = vmatpush3.bf16.msra.mxu0 %v4959_v45 }
  0xc9   :  { %4011 = vmatprep.subr.bf16.mxu0 %v4734_v0 }
  0xcc   :  { %4013 = vmatpush3.bf16.msra.mxu0 %v4967_v51 }
  0xcd   :  { %4038 = vmatprep.subr.bf16.mxu0 %v4734_v0 }
 0x162   :  { %v214_v19 = vpop.f32.mrb[0].mxu0 }
 0x163   :  { %v215_v23 = vadd.f32 %v5055_v18, %v214_v19  ;;  %v3088_v24 = vpop.f32.mrb[1].mxu0 }
 0x164   :  { %v307_v29 = vpop.f32.mrb[0].mxu1  ;;  %v718_v24 = vld [vmem:[#allocation6 + $0x8] sm:$0xff] }
 0x165   :  { %v405_v26 = vadd.f32 %v404_v20, %v215_v23  ;;  %v308_v30 = vadd.f32 %v5061_v25, %v307_v29  ;;  %v3123_v31 = vpop.f32.mrb[1].mxu1 }
 0x167   :  { %v2609_v32 = vmul.f32 -1.442695, %v405_v26  ;;  %v413_v36 = vadd.f32 %v412_v35, %v308_v30 }
 0x169   :  { %4482 = vpow2.f32 %v2609_v32  ;;  %v2610_v37 = vmul.f32 -1.442695, %v413_v36 }
 0x16b   :  { %4484 = vpow2.f32 %v2610_v37 }
 0x173   :  { %v4483_v38 = vpop.eup %4482 }
 0x174   :  { %v409_v41 = vadd.f32 1.0, %v4483_v38 }
 0x175   :  { %v4485_v42 = vpop.eup %4484 }
 0x176   :  { %4486 = vrcp.f32 %v409_v41  ;;  %v417_v43 = vadd.f32 1.0, %v4485_v42  ;;  %v727_v42 = vld [vmem:[#allocation8 + $0x8] sm:$0xff] }
 0x178   :  { %4488 = vrcp.f32 %v417_v43 }
 0x180   :  { %v4487_v50 = vpop.eup %4486 }
 0x182   :  { %v400_v47 = vpop.f32.mrb[2].mxu0  ;;  %v4489_v58 = vpop.eup %4488 }
 0x183   :  { %v401_v48 = vadd.f32 %v5067_v44, %v400_v47  ;;  %v3158_v49 = vpop.f32.mrb[3].mxu0  ;;  %v424_v60 = vsub.f32 1.0, %v4489_v58  ;;  %v426_v2 = vmul.f32 %v4489_v58, %v4973_v52 }
 0x185   :  { %v421_v55 = vmul.f32 %v4487_v50, %v401_v48 }
 0x187   :  { %v422_v57 = vadd.f32 %v421_v55, %v420_v54 }
 0x189   :  { %4490 = vtanh.f32 %v422_v57 }
 0x193   :  { %v4491_v61 = vpop.eup %4490 }
 0x194   :  { %v425_v63 = vmul.f32 %v4491_v61, %v424_v60 }
 0x196   :  { %v5071_v4 = vadd.f32 %v426_v2, %v425_v63  ;;  %v1035_v2 = vld [vmem:[#allocation8 + $0x10] sm:$0xff] }
 0x198   :  { %3192 = vmatmul.mubr.f32.vlgmr.msra.gmra.mrb[2].mxu1 %v5071_v4  ;;  %428 = vst [vmem:[#allocation14] sm:$0xff] %v5071_v4  ;;  %3227 = vmatmul.mubr.f32.vlgmr.msra.gmra.mrb[4].mxu0 %v5071_v4 }
 0x199   :  { %4016 = vmatpush3.bf16.msra.mxu1 %v4975_v53  ;;  %3261 = vmatprep.mubr.msk.f32.mxu1 %vm4735_vm0, %v4736_v1 }
 0x19a   :  { %4017 = vmatprep.subr.bf16.mxu1 %v4734_v0  ;;  %4040 = vmatpush3.bf16.msra.mxu0 %v4910_v5 }
 0x19b   :  { %4041 = vmatprep.subr.bf16.mxu0 %v4734_v0  ;;  %3296 = vmatprep.mubr.msk.f32.mxu0 %vm4735_vm0, %v4736_v1 }
 0x19d   :  { %4019 = vmatpush3.bf16.msra.mxu1 %v4982_v56 }
 0x19e   :  { %4020 = vmatprep.subr.bf16.mxu1 %v4734_v0  ;;  %4043 = vmatpush3.bf16.msra.mxu0 %v4913_v7 }
 0x19f   :  { %4044 = vmatprep.subr.bf16.mxu0 %v4734_v0 }
 0x1a1   :  { %4022 = vmatpush3.bf16.msra.mxu1 %v4993_v59 }
 0x1a2   :  { %4023 = vmatprep.subr.bf16.mxu1 %v4734_v0  ;;  %4046 = vmatpush3.bf16.msra.mxu0 %v4922_v16 }
 0x1a3   :  { %4047 = vmatprep.subr.bf16.mxu0 %v4734_v0 }
 0x1a5   :  { %4025 = vmatpush3.bf16.msra.mxu1 %v4999_v62 }
 0x1a6   :  { %4026 = vmatprep.subr.bf16.mxu1 %v4734_v0  ;;  %4049 = vmatpush3.bf16.msra.mxu0 %v4930_v22 }
 0x1a7   :  { %4050 = vmatprep.subr.bf16.mxu0 %v4734_v0 }
 0x1a9   :  { %4028 = vmatpush3.bf16.msra.mxu1 %v5005_v3 }
 0x1aa   :  { %4029 = vmatprep.subr.bf16.mxu1 %v4734_v0  ;;  %4052 = vmatpush3.bf16.msra.mxu0 %v4938_v28 }
 0x1ab   :  { %4053 = vmatprep.subr.bf16.mxu0 %v4734_v0 }
 0x1ad   :  { %4031 = vmatpush3.bf16.msra.mxu1 %v5011_v8 }
 0x1ae   :  { %4032 = vmatprep.subr.bf16.mxu1 %v4734_v0  ;;  %4055 = vmatpush3.bf16.msra.mxu0 %v4946_v34 }
 0x1af   :  { %4056 = vmatprep.subr.bf16.mxu0 %v4734_v0 }
 0x1b1   :  { %4034 = vmatpush3.bf16.msra.mxu1 %v5017_v11 }
 0x1b2   :  { %4035 = vmatprep.subr.bf16.mxu1 %v4734_v0  ;;  %4058 = vmatpush3.bf16.msra.mxu0 %v4954_v40 }
 0x1b3   :  { %4059 = vmatprep.subr.bf16.mxu0 %v4734_v0 }
 0x1b5   :  { %4037 = vmatpush3.bf16.msra.mxu1 %v5023_v17 }
 0x1b6   :  { %4062 = vmatprep.subr.bf16.mxu1 %v4734_v0  ;;  %4061 = vmatpush3.bf16.msra.mxu0 %v4962_v46 }
 0x1b7   :  { %4086 = vmatprep.subr.bf16.mxu0 %v4734_v0 }
 0x1b8   :  { %3262 = vmatmul.mubr.f32.vlgmr.msra.gmra.mrb[4].mxu1 %v5071_v4 }
 0x1b9   :  { %4064 = vmatpush3.bf16.msra.mxu1 %v4916_v12  ;;  %3331 = vmatprep.mubr.msk.f32.mxu1 %vm4735_vm0, %v4736_v1 }
 0x1ba   :  { %4065 = vmatprep.subr.bf16.mxu1 %v4734_v0 }
 0x1bd   :  { %4067 = vmatpush3.bf16.msra.mxu1 %v4919_v15 }
 0x1be   :  { %4068 = vmatprep.subr.bf16.mxu1 %v4734_v0 }
 0x1c1   :  { %4070 = vmatpush3.bf16.msra.mxu1 %v4927_v21 }
 0x1c2   :  { %4071 = vmatprep.subr.bf16.mxu1 %v4734_v0 }
 0x1c5   :  { %4073 = vmatpush3.bf16.msra.mxu1 %v4935_v27 }
 0x1c6   :  { %4074 = vmatprep.subr.bf16.mxu1 %v4734_v0 }
 0x1c9   :  { %4076 = vmatpush3.bf16.msra.mxu1 %v4943_v33 }
 0x1ca   :  { %4077 = vmatprep.subr.bf16.mxu1 %v4734_v0 }
 0x1cd   :  { %4079 = vmatpush3.bf16.msra.mxu1 %v4951_v39 }
 0x1ce   :  { %4080 = vmatprep.subr.bf16.mxu1 %v4734_v0 }
 0x1d1   :  { %4082 = vmatpush3.bf16.msra.mxu1 %v4959_v45 }
 0x1d2   :  { %4083 = vmatprep.subr.bf16.mxu1 %v4734_v0 }
 0x1d5   :  { %4085 = vmatpush3.bf16.msra.mxu1 %v4967_v51 }
 0x1d6   :  { %4110 = vmatprep.subr.bf16.mxu1 %v4734_v0 }
 0x26b   :  { %v518_v52 = vpop.f32.mrb[2].mxu1  ;;  %v611_v9 = vpop.f32.mrb[4].mxu0 }
 0x26c   :  { %v519_v10 = vadd.f32 %v5055_v18, %v518_v52  ;;  %v3193_v13 = vpop.f32.mrb[3].mxu1  ;;  %v3228_v14 = vpop.f32.mrb[5].mxu0  ;;  %v612_v23 = vadd.f32 %v5061_v25, %v611_v9 }
 0x26e   :  { %v710_v19 = vadd.f32 %v709_v6, %v519_v10  ;;  %v719_v26 = vadd.f32 %v718_v24, %v612_v23  ;;  %v1448_v23 = vld [vmem:[#allocation11 + $0x10] sm:$0xff]  ;;  %v1449_v24 = vld [vmem:[#allocation11 + $0x18] sm:$0xff] }
 0x270   :  { %v2614_v20 = vmul.f32 -1.442695, %v710_v19  ;;  %v2615_v29 = vmul.f32 -1.442695, %v719_v26  ;;  %v5236_v26 = vpack.c.bf16 %v1449_v24, %v1448_v23 }
 0x272   :  { %4492 = vpow2.f32 %v2614_v20  ;;  %v1356_v20 = vld [vmem:[#allocation9 + $0x18] sm:$0xff] }
 0x273   :  { %4494 = vpow2.f32 %v2615_v29  ;;  %v1357_v29 = vld [vmem:[#allocation9 + $0x20] sm:$0xff] }
 0x27c   :  { %v4493_v30 = vpop.eup %4492 }
 0x27d   :  { %v714_v31 = vadd.f32 1.0, %v4493_v30  ;;  %v4495_v32 = vpop.eup %4494  ;;  %v1358_v30 = vld [vmem:[#allocation9 + $0x28] sm:$0xff] }
 0x27e   :  { %v723_v35 = vadd.f32 1.0, %v4495_v32  ;;  %v1451_v32 = vld [vmem:[#allocation11 + $0x28] sm:$0xff] }
 0x27f   :  { %4496 = vrcp.f32 %v714_v31  ;;  %v1450_v31 = vld [vmem:[#allocation11 + $0x20] sm:$0xff] }
 0x280   :  { %4498 = vrcp.f32 %v723_v35  ;;  %v5240_v35 = vpack.c.bf16 %v1358_v30, %v1357_v29  ;;  %v1343_v30 = vld [vmem:[#allocation8 + $0x18] sm:$0xff] }
 0x289   :  { %v4497_v41 = vpop.eup %4496 }
 0x28a   :  { %v4499_v48 = vpop.eup %4498 }
 0x28b   :  { %v704_v36 = vpop.f32.mrb[4].mxu1  ;;  %v731_v49 = vsub.f32 1.0, %v4499_v48  ;;  %v733_v55 = vmul.f32 %v4499_v48, %v5071_v4  ;;  %v1361_v48 = vld [vmem:[#allocation9 + $0x40] sm:$0xff] }
 0x28c   :  { %v705_v37 = vadd.f32 %v5067_v44, %v704_v36  ;;  %v3263_v38 = vpop.f32.mrb[5].mxu1  ;;  %v5244_v36 = vpack.c.bf16 %v1451_v32, %v1450_v31 }
 0x28d   :  { %v1360_v38 = vld [vmem:[#allocation9 + $0x38] sm:$0xff] }
 0x28e   :  { %v728_v43 = vmul.f32 %v4497_v41, %v705_v37  ;;  %v1359_v37 = vld [vmem:[#allocation9 + $0x30] sm:$0xff] }
 0x28f   :  { %v5250_v41 = vpack.c.bf16 %v1360_v38, %v1359_v37  ;;  %v1539_v38 = vld [vmem:[#allocation12] sm:$0xff] }
 0x290   :  { %v729_v47 = vadd.f32 %v728_v43, %v727_v42  ;;  %v1452_v42 = vld [vmem:[#allocation11 + $0x30] sm:$0xff]  ;;  %v1453_v43 = vld [vmem:[#allocation11 + $0x38] sm:$0xff] }
 0x292   :  { %4500 = vtanh.f32 %v729_v47  ;;  %v5253_v47 = vpack.c.bf16 %v1453_v43, %v1452_v42  ;;  %v1540_v42 = vld [vmem:[#allocation12 + $0x8] sm:$0xff] }
 0x29c   :  { %v4501_v50 = vpop.eup %4500 }
 0x29d   :  { %v732_v54 = vmul.f32 %v4501_v50, %v731_v49  ;;  %v1362_v49 = vld [vmem:[#allocation9 + $0x48] sm:$0xff] }
 0x29e   :  { %v5258_v50 = vpack.c.bf16 %v1362_v49, %v1361_v48 }
 0x29f   :  { %v5135_v57 = vadd.f32 %v733_v55, %v732_v54  ;;  %v1454_v54 = vld [vmem:[#allocation11 + $0x40] sm:$0xff]  ;;  %v1455_v55 = vld [vmem:[#allocation11 + $0x48] sm:$0xff] }
 0x2a1   :  { %3297 = vmatmul.mubr.f32.vlgmr.msra.gmra.mrb[6].mxu0 %v5135_v57  ;;  %736 = vst [vmem:[#allocation14 + $0x8] sm:$0xff] %v5135_v57  ;;  %3332 = vmatmul.mubr.f32.vlgmr.msra.gmra.mrb[6].mxu1 %v5135_v57 }
 0x2a2   :  { %4088 = vmatpush3.bf16.msra.mxu0 %v4975_v53  ;;  %3366 = vmatprep.mubr.msk.f32.mxu0 %vm4735_vm0, %v4736_v1 }
 0x2a3   :  { %4089 = vmatprep.subr.bf16.mxu0 %v4734_v0  ;;  %4112 = vmatpush3.bf16.msra.mxu1 %v4910_v5 }
 0x2a4   :  { %4113 = vmatprep.subr.bf16.mxu1 %v4734_v0  ;;  %3401 = vmatprep.mubr.msk.f32.mxu1 %vm4735_vm0, %v4736_v1 }
 0x2a6   :  { %4091 = vmatpush3.bf16.msra.mxu0 %v4982_v56 }
 0x2a7   :  { %4092 = vmatprep.subr.bf16.mxu0 %v4734_v0  ;;  %4115 = vmatpush3.bf16.msra.mxu1 %v4913_v7  ;;  %v1017_v7 = vld [vmem:[#allocation3 + $0x10] sm:$0xff] }
 0x2a8   :  { %4116 = vmatprep.subr.bf16.mxu1 %v4734_v0 }
 0x2aa   :  { %4094 = vmatpush3.bf16.msra.mxu0 %v4993_v59 }
 0x2ab   :  { %4095 = vmatprep.subr.bf16.mxu0 %v4734_v0  ;;  %4118 = vmatpush3.bf16.msra.mxu1 %v4922_v16 }
 0x2ac   :  { %4119 = vmatprep.subr.bf16.mxu1 %v4734_v0 }
 0x2ae   :  { %4097 = vmatpush3.bf16.msra.mxu0 %v4999_v62 }
 0x2af   :  { %4098 = vmatprep.subr.bf16.mxu0 %v4734_v0  ;;  %4121 = vmatpush3.bf16.msra.mxu1 %v4930_v22 }
 0x2b0   :  { %4122 = vmatprep.subr.bf16.mxu1 %v4734_v0 }
 0x2b2   :  { %4100 = vmatpush3.bf16.msra.mxu0 %v5005_v3 }
 0x2b3   :  { %4101 = vmatprep.subr.bf16.mxu0 %v4734_v0  ;;  %4124 = vmatpush3.bf16.msra.mxu1 %v4938_v28 }
 0x2b4   :  { %4125 = vmatprep.subr.bf16.mxu1 %v4734_v0 }
 0x2b6   :  { %4103 = vmatpush3.bf16.msra.mxu0 %v5011_v8 }
 0x2b7   :  { %4104 = vmatprep.subr.bf16.mxu0 %v4734_v0  ;;  %4127 = vmatpush3.bf16.msra.mxu1 %v4946_v34 }
 0x2b8   :  { %4128 = vmatprep.subr.bf16.mxu1 %v4734_v0 }
 0x2ba   :  { %4106 = vmatpush3.bf16.msra.mxu0 %v5017_v11 }
 0x2bb   :  { %4107 = vmatprep.subr.bf16.mxu0 %v4734_v0  ;;  %4130 = vmatpush3.bf16.msra.mxu1 %v4954_v40 }
 0x2bc   :  { %4131 = vmatprep.subr.bf16.mxu1 %v4734_v0 }
 0x2be   :  { %4109 = vmatpush3.bf16.msra.mxu0 %v5023_v17 }
 0x2bf   :  { %4134 = vmatprep.subr.bf16.mxu0 %v4734_v0  ;;  %4133 = vmatpush3.bf16.msra.mxu1 %v4962_v46 }
 0x2c0   :  { %4158 = vmatprep.subr.bf16.mxu1 %v4734_v0 }
 0x2c1   :  { %3367 = vmatmul.mubr.f32.vlgmr.msra.gmra.mrb[8].mxu0 %v5135_v57 }
 0x2c2   :  { %4136 = vmatpush3.bf16.msra.mxu0 %v4916_v12  ;;  %3436 = vmatprep.mubr.msk.f32.mxu0 %vm4735_vm0, %v4736_v1 }
 0x2c3   :  { %4137 = vmatprep.subr.bf16.mxu0 %v4734_v0 }
 0x2c6   :  { %4139 = vmatpush3.bf16.msra.mxu0 %v4919_v15 }
 0x2c7   :  { %4140 = vmatprep.subr.bf16.mxu0 %v4734_v0 }
 0x2ca   :  { %4142 = vmatpush3.bf16.msra.mxu0 %v4927_v21 }
 0x2cb   :  { %4143 = vmatprep.subr.bf16.mxu0 %v4734_v0 }
 0x2ce   :  { %4145 = vmatpush3.bf16.msra.mxu0 %v4935_v27 }
 0x2cf   :  { %4146 = vmatprep.subr.bf16.mxu0 %v4734_v0 }
 0x2d2   :  { %4148 = vmatpush3.bf16.msra.mxu0 %v4943_v33  ;;  %v1026_v33 = vld [vmem:[#allocation6 + $0x10] sm:$0xff] }
 0x2d3   :  { %4149 = vmatprep.subr.bf16.mxu0 %v4734_v0 }
 0x2d6   :  { %4151 = vmatpush3.bf16.msra.mxu0 %v4951_v39 }
 0x2d7   :  { %4152 = vmatprep.subr.bf16.mxu0 %v4734_v0 }
 0x2da   :  { %4154 = vmatpush3.bf16.msra.mxu0 %v4959_v45 }
 0x2db   :  { %4155 = vmatprep.subr.bf16.mxu0 %v4734_v0 }
 0x2de   :  { %4157 = vmatpush3.bf16.msra.mxu0 %v4967_v51 }
 0x2df   :  { %4182 = vmatprep.subr.bf16.mxu0 %v4734_v0 }
 0x374   :  { %v826_v5 = vpop.f32.mrb[6].mxu0  ;;  %v919_v12 = vpop.f32.mrb[6].mxu1 }
 0x375   :  { %v827_v15 = vadd.f32 %v5055_v18, %v826_v5  ;;  %v3298_v16 = vpop.f32.mrb[7].mxu0  ;;  %v3333_v21 = vpop.f32.mrb[7].mxu1  ;;  %v920_v28 = vadd.f32 %v5061_v25, %v919_v12  ;;  %v1363_v5 = vld [vmem:[#allocation9 + $0x50] sm:$0xff] }
 0x376   :  { %v1456_v12 = vld [vmem:[#allocation11 + $0x50] sm:$0xff]  ;;  %v1457_v16 = vld [vmem:[#allocation11 + $0x58] sm:$0xff]  ;;  %v1365_v21 = vld [vmem:[#allocation9 + $0x60] sm:$0xff] }
 0x377   :  { %v1018_v22 = vadd.f32 %v1017_v7, %v827_v15  ;;  %v1027_v34 = vadd.f32 %v1026_v33, %v920_v28  ;;  %v1364_v7 = vld [vmem:[#allocation9 + $0x58] sm:$0xff]  ;;  %v1458_v28 = vld [vmem:[#allocation11 + $0x60] sm:$0xff]  ;;  %v1459_v33 = vld [vmem:[#allocation11 + $0x68] sm:$0xff] }
 0x378   :  { %v5266_v15 = vpack.c.bf16 %v1364_v7, %v1363_v5  ;;  %v1542_v5 = vld [vmem:[#allocation12 + $0x18] sm:$0xff] }
 0x379   :  { %v2619_v27 = vmul.f32 -1.442695, %v1018_v22  ;;  %v2620_v39 = vmul.f32 -1.442695, %v1027_v34  ;;  %v1366_v22 = vld [vmem:[#allocation9 + $0x68] sm:$0xff] }
 0x37a   :  { %v5272_v34 = vpack.c.bf16 %v1366_v22, %v1365_v21  ;;  %v1545_v21 = vld [vmem:[#allocation12 + $0x30] sm:$0xff]  ;;  %v1546_v22 = vld [vmem:[#allocation12 + $0x38] sm:$0xff] }
 0x37b   :  { %4502 = vpow2.f32 %v2619_v27  ;;  %v5269_v27 = vpack.c.bf16 %v1457_v16, %v1456_v12  ;;  %v1544_v12 = vld [vmem:[#allocation12 + $0x28] sm:$0xff] }
 0x37c   :  { %4504 = vpow2.f32 %v2620_v39  ;;  %v5276_v39 = vpack.c.bf16 %v1459_v33, %v1458_v28  ;;  %v5319_v28 = vpack.c.bf16 %v1546_v22, %v1545_v21  ;;  %v1547_v33 = vld [vmem:[#allocation12 + $0x40] sm:$0xff] }
 0x385   :  { %v4503_v40 = vpop.eup %4502 }
 0x386   :  { %v1022_v45 = vadd.f32 1.0, %v4503_v40  ;;  %v4505_v46 = vpop.eup %4504  ;;  %v1367_v40 = vld [vmem:[#allocation9 + $0x70] sm:$0xff] }
 0x387   :  { %v1031_v51 = vadd.f32 1.0, %v4505_v46  ;;  %v1460_v46 = vld [vmem:[#allocation11 + $0x70] sm:$0xff] }
 0x388   :  { %4506 = vrcp.f32 %v1022_v45  ;;  %v1368_v45 = vld [vmem:[#allocation9 + $0x78] sm:$0xff] }
 0x389   :  { %4508 = vrcp.f32 %v1031_v51  ;;  %v1461_v51 = vld [vmem:[#allocation11 + $0x78] sm:$0xff] }
 0x392   :  { %v4507_v63 = vpop.eup %4506 }
 0x393   :  { %v4509_v6 = vpop.eup %4508 }
 0x394   :  { %v1012_v58 = vpop.f32.mrb[8].mxu0  ;;  %v1039_v9 = vsub.f32 1.0, %v4509_v6  ;;  %v1041_v14 = vmul.f32 %v4509_v6, %v5135_v57  ;;  %v5261_v57 = vpack.c.bf16 %v1455_v55, %v1454_v54  ;;  %v5295_v54 = vpack.c.bf16 %v1540_v42, %v1539_v38 }
 0x395   :  { %v1013_v60 = vadd.f32 %v5067_v44, %v1012_v58  ;;  %v3368_v61 = vpop.f32.mrb[9].mxu0  ;;  %v5280_v58 = vpack.c.bf16 %v1368_v45, %v1367_v40  ;;  %v1548_v40 = vld [vmem:[#allocation12 + $0x48] sm:$0xff] }
 0x396   :  { %v5325_v45 = vpack.c.bf16 %v1548_v40, %v1547_v33 }
 0x397   :  { %v1036_v4 = vmul.f32 %v4507_v63, %v1013_v60  ;;  %v5284_v60 = vpack.c.bf16 %v1461_v51, %v1460_v46  ;;  %v1325_v63 = vld [vmem:[#allocation3 + $0x18] sm:$0xff]  ;;  %v1549_v46 = vld [vmem:[#allocation12 + $0x50] sm:$0xff] }
 0x398   :  { %v1550_v51 = vld [vmem:[#allocation12 + $0x58] sm:$0xff] }
 0x399   :  { %v1037_v52 = vadd.f32 %v1036_v4, %v1035_v2 }
 0x39b   :  { %4510 = vtanh.f32 %v1037_v52 }
 0x3a5   :  { %v4511_v10 = vpop.eup %4510 }
 0x3a6   :  { %v1040_v13 = vmul.f32 %v4511_v10, %v1039_v9 }
 0x3a8   :  { %v5199_v19 = vadd.f32 %v1041_v14, %v1040_v13  ;;  %v1334_v14 = vld [vmem:[#allocation6 + $0x18] sm:$0xff] }
 0x3aa   :  { %3402 = vmatmul.mubr.f32.vlgmr.msra.gmra.mrb[8].mxu1 %v5199_v19  ;;  %1044 = vst [vmem:[#allocation14 + $0x10] sm:$0xff] %v5199_v19  ;;  %3437 = vmatmul.mubr.f32.vlgmr.msra.gmra.mrb[10].mxu0 %v5199_v19 }
 0x3ab   :  { %4160 = vmatpush3.bf16.msra.mxu1 %v4975_v53  ;;  %3471 = vmatprep.mubr.msk.f32.mxu1 %vm4735_vm0, %v4736_v1  ;;  %v1353_v53 = vld [vmem:[#allocation9] sm:$0xff] }
 0x3ac   :  { %4161 = vmatprep.subr.bf16.mxu1 %v4734_v0  ;;  %3506 = vmatprep.mubr.msk.f32.mxu0 %vm4735_vm0, %v4736_v1 }
 0x3af   :  { %4163 = vmatpush3.bf16.msra.mxu1 %v4982_v56  ;;  %v1354_v56 = vld [vmem:[#allocation9 + $0x8] sm:$0xff] }
 0x3b0   :  { %4164 = vmatprep.subr.bf16.mxu1 %v4734_v0 }
 0x3b3   :  { %4166 = vmatpush3.bf16.msra.mxu1 %v4993_v59  ;;  %v5227_v59 = vpack.c.bf16 %v1354_v56, %v1353_v53 }
 0x3b4   :  { %4167 = vmatprep.subr.bf16.mxu1 %v4734_v0 }
 0x3b5   :  { %4184 = vmatpush3.bf16.msra.mxu0 %v5227_v59 }
 0x3b6   :  { %4185 = vmatprep.subr.bf16.mxu0 %v4734_v0 }
 0x3b7   :  { %4169 = vmatpush3.bf16.msra.mxu1 %v4999_v62  ;;  %v1446_v62 = vld [vmem:[#allocation11] sm:$0xff] }
 0x3b8   :  { %4170 = vmatprep.subr.bf16.mxu1 %v4734_v0 }
 0x3bb   :  { %4172 = vmatpush3.bf16.msra.mxu1 %v5005_v3  ;;  %v1447_v3 = vld [vmem:[#allocation11 + $0x8] sm:$0xff] }
 0x3bc   :  { %4173 = vmatprep.subr.bf16.mxu1 %v4734_v0 }
 0x3bf   :  { %4175 = vmatpush3.bf16.msra.mxu1 %v5011_v8  ;;  %v5229_v8 = vpack.c.bf16 %v1447_v3, %v1446_v62 }
 0x3c0   :  { %4176 = vmatprep.subr.bf16.mxu1 %v4734_v0 }
 0x3c3   :  { %4178 = vmatpush3.bf16.msra.mxu1 %v5017_v11  ;;  %v1355_v11 = vld [vmem:[#allocation9 + $0x10] sm:$0xff] }
 0x3c4   :  { %4179 = vmatprep.subr.bf16.mxu1 %v4734_v0 }
 0x3c7   :  { %4181 = vmatpush3.bf16.msra.mxu1 %v5023_v17  ;;  %v5232_v17 = vpack.c.bf16 %v1356_v20, %v1355_v11 }
 0x3c8   :  { %4206 = vmatprep.subr.bf16.mxu1 %v4734_v0 }
 0x3c9   :  { %4187 = vmatpush3.bf16.msra.mxu0 %v5232_v17 }
 0x3ca   :  { %3472 = vmatmul.mubr.f32.vlgmr.msra.gmra.mrb[10].mxu1 %v5199_v19  ;;  %4188 = vmatprep.subr.bf16.mxu0 %v4734_v0 }
 0x3cb   :  { %3541 = vmatprep.mubr.msk.f32.mxu1 %vm4735_vm0, %v4736_v1  ;;  %4208 = vmatpush3.bf16.msra.mxu1 %v5229_v8 }
 0x3cc   :  { %4209 = vmatprep.subr.bf16.mxu1 %v4734_v0 }
 0x3cd   :  { %4190 = vmatpush3.bf16.msra.mxu0 %v5240_v35 }
 0x3ce   :  { %4191 = vmatprep.subr.bf16.mxu0 %v4734_v0 }
 0x3cf   :  { %4211 = vmatpush3.bf16.msra.mxu1 %v5236_v26 }
 0x3d0   :  { %4212 = vmatprep.subr.bf16.mxu1 %v4734_v0 }
 0x3d1   :  { %4193 = vmatpush3.bf16.msra.mxu0 %v5250_v41 }
 0x3d2   :  { %4194 = vmatprep.subr.bf16.mxu0 %v4734_v0 }
 0x3d3   :  { %4214 = vmatpush3.bf16.msra.mxu1 %v5244_v36 }
 0x3d4   :  { %4215 = vmatprep.subr.bf16.mxu1 %v4734_v0 }
 0x3d5   :  { %4196 = vmatpush3.bf16.msra.mxu0 %v5258_v50 }
 0x3d6   :  { %4197 = vmatprep.subr.bf16.mxu0 %v4734_v0 }
 0x3d7   :  { %4217 = vmatpush3.bf16.msra.mxu1 %v5253_v47 }
 0x3d8   :  { %4218 = vmatprep.subr.bf16.mxu1 %v4734_v0 }
 0x3d9   :  { %4199 = vmatpush3.bf16.msra.mxu0 %v5266_v15 }
 0x3da   :  { %4200 = vmatprep.subr.bf16.mxu0 %v4734_v0 }
 0x3db   :  { %4220 = vmatpush3.bf16.msra.mxu1 %v5261_v57 }
 0x3dc   :  { %4221 = vmatprep.subr.bf16.mxu1 %v4734_v0 }
 0x3dd   :  { %4202 = vmatpush3.bf16.msra.mxu0 %v5272_v34 }
 0x3de   :  { %4203 = vmatprep.subr.bf16.mxu0 %v4734_v0 }
 0x3df   :  { %4223 = vmatpush3.bf16.msra.mxu1 %v5269_v27 }
 0x3e0   :  { %4224 = vmatprep.subr.bf16.mxu1 %v4734_v0 }
 0x3e1   :  { %4205 = vmatpush3.bf16.msra.mxu0 %v5280_v58 }
 0x3e2   :  { %4230 = vmatprep.subr.bf16.mxu0 %v4734_v0 }
 0x3e3   :  { %4226 = vmatpush3.bf16.msra.mxu1 %v5276_v39 }
 0x3e4   :  { %4227 = vmatprep.subr.bf16.mxu1 %v4734_v0 }
 0x3e7   :  { %4229 = vmatpush3.bf16.msra.mxu1 %v5284_v60 }
 0x3e8   :  { %4254 = vmatprep.subr.bf16.mxu1 %v4734_v0 }
 0x47d   :  { %v1134_v61 = vpop.f32.mrb[8].mxu1  ;;  %v1227_v2 = vpop.f32.mrb[10].mxu0 }
 0x47e   :  { %v1135_v4 = vadd.f32 %v5055_v18, %v1134_v61  ;;  %v3403_v52 = vpop.f32.mrb[9].mxu1  ;;  %v3438_v6 = vpop.f32.mrb[11].mxu0  ;;  %v1228_v13 = vadd.f32 %v5061_v25, %v1227_v2  ;;  %v5331_v61 = vpack.c.bf16 %v1550_v51, %v1549_v46  ;;  %v1552_v2 = vld [vmem:[#allocation12 + $0x68] sm:$0xff] }
 0x47f   :  { %v1553_v52 = vld [vmem:[#allocation12 + $0x70] sm:$0xff]  ;;  %v1554_v6 = vld [vmem:[#allocation12 + $0x78] sm:$0xff]  ;;  %v1941_v51 = vld [vmem:[#allocation3 + $0x28] sm:$0xff] }
 0x480   :  { %v1326_v9 = vadd.f32 %v1325_v63, %v1135_v4  ;;  %v1335_v53 = vadd.f32 %v1334_v14, %v1228_v13  ;;  %v1551_v63 = vld [vmem:[#allocation12 + $0x60] sm:$0xff] }
 0x481   :  { %v5337_v4 = vpack.c.bf16 %v1552_v2, %v1551_v63  ;;  %v1633_v14 = vld [vmem:[#allocation3 + $0x20] sm:$0xff] }
 0x482   :  { %v2624_v10 = vmul.f32 -1.442695, %v1326_v9  ;;  %v2625_v56 = vmul.f32 -1.442695, %v1335_v53  ;;  %v5343_v9 = vpack.c.bf16 %v1554_v6, %v1553_v52 }
 0x484   :  { %4512 = vpow2.f32 %v2624_v10  ;;  %v5374_v10 = vld [vmem:[%s5558_s6] ss:$0 sm:$0xff] }
 0x485   :  { %4514 = vpow2.f32 %v2625_v56 }
 0x48e   :  { %v4513_v62 = vpop.eup %4512 }
 0x48f   :  { %v1330_v3 = vadd.f32 1.0, %v4513_v62  ;;  %v4515_v11 = vpop.eup %4514 }
 0x490   :  { %v1339_v20 = vadd.f32 1.0, %v4515_v11 }
 0x491   :  { %4516 = vrcp.f32 %v1330_v3 }
 0x492   :  { %4518 = vrcp.f32 %v1339_v20  ;;  %v5380_v20 = vld [vmem:[%s5559_s7] ss:$0 sm:$0xff]  ;;  %s4737_s7 = smov [#allocation14]  }
 0x49b   :  { %v4517_v29 = vpop.eup %4516 }
 0x49c   :  { %v4519_v25 = vpop.eup %4518 }
 0x49d   :  { %v1320_v23 = vpop.f32.mrb[10].mxu1  ;;  %v1347_v37 = vsub.f32 1.0, %v4519_v25  ;;  %v1349_v49 = vmul.f32 %v4519_v25, %v5199_v19  ;;  %v1543_v19 = vld [vmem:[#allocation12 + $0x20] sm:$0xff] }
 0x49e   :  { %v1321_v24 = vadd.f32 %v5067_v44, %v1320_v23  ;;  %v3473_v18 = vpop.f32.mrb[11].mxu1  ;;  %v1541_v44 = vld [vmem:[#allocation12 + $0x10] sm:$0xff]  ;;  %v5313_v16 = vpack.c.bf16 %v1544_v12, %v1543_v19 }
 0x49f   :  { %v5303_v7 = vpack.c.bf16 %v1542_v5, %v1541_v44  ;;  %v1642_v18 = vld [vmem:[#allocation6 + $0x20] sm:$0xff] }
 0x4a0   :  { %v1344_v31 = vmul.f32 %v4517_v29, %v1321_v24  ;;  %v1651_v44 = vld [vmem:[#allocation8 + $0x20] sm:$0xff] }
 0x4a2   :  { %v1345_v32 = vadd.f32 %v1344_v31, %v1343_v30 }
 0x4a4   :  { %4520 = vtanh.f32 %v1345_v32 }
 0x4ae   :  { %v4521_v43 = vpop.eup %4520 }
 0x4af   :  { %v1348_v48 = vmul.f32 %v4521_v43, %v1347_v37  ;;  %v5386_v37 = vld [vmem:[%s5560_s8] ss:$0 sm:$0xff]  ;;  %s2591_s8 = sshll.u32 %s4737_s7, 4  ;;  %s2592_s8 = int_to_ptr.vmem [resolvable:$true] %s2591_s8 }
 0x4b0   :  { %s4694_s22 = scalar_lea.vmem %s2592_s8, 1024  ;;  %p4699_p7 = scmp.lt.s32.totalorder %s2592_s8, %s2592_s8 }
 0x4b1   :  { %v5297_v55 = vadd.f32 %v1349_v49, %v1348_v48  ;;  %p4695_p6 = scmp.ne.s32.totalorder %s2592_s8, %s4694_s22  ;;  %p4700_p8 = scmp.lt.s32.totalorder %s4694_s22, %s4694_s22 }
 0x4b3   :  { %3507 = vmatmul.mubr.f32.vlgmr.msra.gmra.mrb[12].mxu0 %v5297_v55  ;;  %1352 = vst [vmem:[#allocation14 + $0x18] sm:$0xff] %v5297_v55  ;;  %3542 = vmatmul.mubr.f32.vlgmr.msra.gmra.mrb[12].mxu1 %v5297_v55  ;;  %p4701_p9 = por %p4700_p8, %p4699_p7 }
 0x4b4   :  { %4232 = vmatpush3.bf16.msra.mxu0 %v5295_v54  ;;  %3576 = vmatprep.mubr.msk.f32.mxu0 %vm4735_vm0, %v4736_v1 }
 0x4b5   :  { %4233 = vmatprep.subr.bf16.mxu0 %v4734_v0  ;;  %4256 = vmatpush3.bf16.msra.mxu1 %v5227_v59  ;;  %p4702_p10 = pnand %p4701_p9, %p4695_p6 }
 0x4b6   :  { %4257 = vmatprep.subr.bf16.mxu1 %v4734_v0  ;;  %3611 = vmatprep.mubr.msk.f32.mxu1 %vm4735_vm0, %v4736_v1 }
 0x4b8   :  { %4235 = vmatpush3.bf16.msra.mxu0 %v5303_v7 }
 0x4b9   :  { %4236 = vmatprep.subr.bf16.mxu0 %v4734_v0  ;;  %4259 = vmatpush3.bf16.msra.mxu1 %v5232_v17 }
 0x4ba   :  { %4260 = vmatprep.subr.bf16.mxu1 %v4734_v0 }
 0x4bc   :  { %4238 = vmatpush3.bf16.msra.mxu0 %v5313_v16 }
 0x4bd   :  { %4239 = vmatprep.subr.bf16.mxu0 %v4734_v0  ;;  %4262 = vmatpush3.bf16.msra.mxu1 %v5240_v35 }
 0x4be   :  { %4263 = vmatprep.subr.bf16.mxu1 %v4734_v0 }
 0x4c0   :  { %4241 = vmatpush3.bf16.msra.mxu0 %v5319_v28 }
 0x4c1   :  { %4242 = vmatprep.subr.bf16.mxu0 %v4734_v0  ;;  %4265 = vmatpush3.bf16.msra.mxu1 %v5250_v41 }
 0x4c2   :  { %4266 = vmatprep.subr.bf16.mxu1 %v4734_v0 }
 0x4c4   :  { %4244 = vmatpush3.bf16.msra.mxu0 %v5325_v45 }
 0x4c5   :  { %4245 = vmatprep.subr.bf16.mxu0 %v4734_v0  ;;  %4268 = vmatpush3.bf16.msra.mxu1 %v5258_v50 }
 0x4c6   :  { %4269 = vmatprep.subr.bf16.mxu1 %v4734_v0 }
 0x4c8   :  { %4247 = vmatpush3.bf16.msra.mxu0 %v5331_v61 }
 0x4c9   :  { %4248 = vmatprep.subr.bf16.mxu0 %v4734_v0  ;;  %4271 = vmatpush3.bf16.msra.mxu1 %v5266_v15 }
 0x4ca   :  { %4272 = vmatprep.subr.bf16.mxu1 %v4734_v0 }
 0x4cc   :  { %4250 = vmatpush3.bf16.msra.mxu0 %v5337_v4 }
 0x4cd   :  { %4251 = vmatprep.subr.bf16.mxu0 %v4734_v0  ;;  %4274 = vmatpush3.bf16.msra.mxu1 %v5272_v34 }
 0x4ce   :  { %4275 = vmatprep.subr.bf16.mxu1 %v4734_v0 }
 0x4d0   :  { %4253 = vmatpush3.bf16.msra.mxu0 %v5343_v9 }
 0x4d1   :  { %4278 = vmatprep.subr.bf16.mxu0 %v4734_v0  ;;  %4277 = vmatpush3.bf16.msra.mxu1 %v5280_v58 }
 0x4d2   :  { %4302 = vmatprep.subr.bf16.mxu1 %v4734_v0 }
 0x4d3   :  { %3577 = vmatmul.mubr.f32.vlgmr.msra.gmra.mrb[14].mxu0 %v5297_v55 }
 0x4d4   :  { %4280 = vmatpush3.bf16.msra.mxu0 %v5229_v8  ;;  %3646 = vmatprep.mubr.msk.f32.mxu0 %vm4735_vm0, %v4736_v1 }
 0x4d5   :  { %4281 = vmatprep.subr.bf16.mxu0 %v4734_v0 }
 0x4d8   :  { %4283 = vmatpush3.bf16.msra.mxu0 %v5236_v26 }
 0x4d9   :  { %4284 = vmatprep.subr.bf16.mxu0 %v4734_v0 }
 0x4dc   :  { %4286 = vmatpush3.bf16.msra.mxu0 %v5244_v36 }
 0x4dd   :  { %4287 = vmatprep.subr.bf16.mxu0 %v4734_v0 }
 0x4e0   :  { %4289 = vmatpush3.bf16.msra.mxu0 %v5253_v47 }
 0x4e1   :  { %4290 = vmatprep.subr.bf16.mxu0 %v4734_v0 }
 0x4e4   :  { %4292 = vmatpush3.bf16.msra.mxu0 %v5261_v57 }
 0x4e5   :  { %4293 = vmatprep.subr.bf16.mxu0 %v4734_v0 }
 0x4e8   :  { %4295 = vmatpush3.bf16.msra.mxu0 %v5269_v27 }
 0x4e9   :  { %4296 = vmatprep.subr.bf16.mxu0 %v4734_v0 }
 0x4ec   :  { %4298 = vmatpush3.bf16.msra.mxu0 %v5276_v39 }
 0x4ed   :  { %4299 = vmatprep.subr.bf16.mxu0 %v4734_v0 }
 0x4f0   :  { %4301 = vmatpush3.bf16.msra.mxu0 %v5284_v60 }
 0x4f1   :  { %4326 = vmatprep.subr.bf16.mxu0 %v4734_v0 }
 0x586   :  { %v1442_v13 = vpop.f32.mrb[12].mxu0  ;;  %v1535_v53 = vpop.f32.mrb[12].mxu1 }
 0x587   :  { %v1443_v56 = vadd.f32 %v5374_v10, %v1442_v13  ;;  %v3508_v62 = vpop.f32.mrb[13].mxu0  ;;  %v3543_v3 = vpop.f32.mrb[13].mxu1  ;;  %v1536_v24 = vadd.f32 %v5380_v20, %v1535_v53 }
 0x589   :  { %v1634_v11 = vadd.f32 %v1633_v14, %v1443_v56  ;;  %v1643_v29 = vadd.f32 %v1642_v18, %v1536_v24  ;;  %v1950_v56 = vld [vmem:[#allocation6 + $0x28] sm:$0xff] }
 0x58b   :  { %v2629_v23 = vmul.f32 -1.442695, %v1634_v11  ;;  %v2630_v30 = vmul.f32 -1.442695, %v1643_v29 }
 0x58d   :  { %4522 = vpow2.f32 %v2629_v23 }
 0x58e   :  { %4524 = vpow2.f32 %v2630_v30 }
 0x597   :  { %v4523_v31 = vpop.eup %4522 }
 0x598   :  { %v1638_v32 = vadd.f32 1.0, %v4523_v31  ;;  %v4525_v25 = vpop.eup %4524 }
 0x599   :  { %v1647_v38 = vadd.f32 1.0, %v4525_v25  ;;  %v1959_v25 = vld [vmem:[#allocation8 + $0x28] sm:$0xff] }
 0x59a   :  { %4526 = vrcp.f32 %v1638_v32 }
 0x59b   :  { %4528 = vrcp.f32 %v1647_v38 }
 0x5a4   :  { %v4527_v49 = vpop.eup %4526 }
 0x5a5   :  { %v4529_v12 = vpop.eup %4528 }
 0x5a6   :  { %v1628_v42 = vpop.f32.mrb[14].mxu0  ;;  %v1655_v21 = vsub.f32 1.0, %v4529_v12  ;;  %v1657_v40 = vmul.f32 %v4529_v12, %v5297_v55 }
 0x5a7   :  { %v1629_v43 = vadd.f32 %v5386_v37, %v1628_v42  ;;  %v3578_v48 = vpop.f32.mrb[15].mxu0 }
 0x5a9   :  { %v1652_v5 = vmul.f32 %v4527_v49, %v1629_v43 }
 0x5ab   :  { %v1653_v19 = vadd.f32 %v1652_v5, %v1651_v44 }
 0x5ad   :  { %4530 = vtanh.f32 %v1653_v19 }
 0x5b7   :  { %v4531_v22 = vpop.eup %4530 }
 0x5b8   :  { %v1656_v33 = vmul.f32 %v4531_v22, %v1655_v21 }
 0x5ba   :  { %v5390_v46 = vadd.f32 %v1657_v40, %v1656_v33  ;;  %v2267_v40 = vld [vmem:[#allocation8 + $0x30] sm:$0xff] }
 0x5bc   :  { %3612 = vmatmul.mubr.f32.vlgmr.msra.gmra.mrb[14].mxu1 %v5390_v46  ;;  %1660 = vst [vmem:[#allocation14 + $0x20] sm:$0xff] %v5390_v46  ;;  %3647 = vmatmul.mubr.f32.vlgmr.msra.gmra.mrb[16].mxu0 %v5390_v46 }
 0x5bd   :  { %4304 = vmatpush3.bf16.msra.mxu1 %v5295_v54  ;;  %3681 = vmatprep.mubr.msk.f32.mxu1 %vm4735_vm0, %v4736_v1 }
 0x5be   :  { %4305 = vmatprep.subr.bf16.mxu1 %v4734_v0  ;;  %4328 = vmatpush3.bf16.msra.mxu0 %v5227_v59 }
 0x5bf   :  { %4329 = vmatprep.subr.bf16.mxu0 %v4734_v0  ;;  %3716 = vmatprep.mubr.msk.f32.mxu0 %vm4735_vm0, %v4736_v1 }
 0x5c1   :  { %4307 = vmatpush3.bf16.msra.mxu1 %v5303_v7 }
 0x5c2   :  { %4308 = vmatprep.subr.bf16.mxu1 %v4734_v0  ;;  %4331 = vmatpush3.bf16.msra.mxu0 %v5232_v17 }
 0x5c3   :  { %4332 = vmatprep.subr.bf16.mxu0 %v4734_v0 }
 0x5c5   :  { %4310 = vmatpush3.bf16.msra.mxu1 %v5313_v16 }
 0x5c6   :  { %4311 = vmatprep.subr.bf16.mxu1 %v4734_v0  ;;  %4334 = vmatpush3.bf16.msra.mxu0 %v5240_v35 }
 0x5c7   :  { %4335 = vmatprep.subr.bf16.mxu0 %v4734_v0 }
 0x5c9   :  { %4313 = vmatpush3.bf16.msra.mxu1 %v5319_v28 }
 0x5ca   :  { %4314 = vmatprep.subr.bf16.mxu1 %v4734_v0  ;;  %4337 = vmatpush3.bf16.msra.mxu0 %v5250_v41 }
 0x5cb   :  { %4338 = vmatprep.subr.bf16.mxu0 %v4734_v0 }
 0x5cd   :  { %4316 = vmatpush3.bf16.msra.mxu1 %v5325_v45 }
 0x5ce   :  { %4317 = vmatprep.subr.bf16.mxu1 %v4734_v0  ;;  %4340 = vmatpush3.bf16.msra.mxu0 %v5258_v50 }
 0x5cf   :  { %4341 = vmatprep.subr.bf16.mxu0 %v4734_v0 }
 0x5d1   :  { %4319 = vmatpush3.bf16.msra.mxu1 %v5331_v61 }
 0x5d2   :  { %4320 = vmatprep.subr.bf16.mxu1 %v4734_v0  ;;  %4343 = vmatpush3.bf16.msra.mxu0 %v5266_v15 }
 0x5d3   :  { %4344 = vmatprep.subr.bf16.mxu0 %v4734_v0 }
 0x5d5   :  { %4322 = vmatpush3.bf16.msra.mxu1 %v5337_v4 }
 0x5d6   :  { %4323 = vmatprep.subr.bf16.mxu1 %v4734_v0  ;;  %4346 = vmatpush3.bf16.msra.mxu0 %v5272_v34 }
 0x5d7   :  { %4347 = vmatprep.subr.bf16.mxu0 %v4734_v0 }
 0x5d9   :  { %4325 = vmatpush3.bf16.msra.mxu1 %v5343_v9 }
 0x5da   :  { %4350 = vmatprep.subr.bf16.mxu1 %v4734_v0  ;;  %4349 = vmatpush3.bf16.msra.mxu0 %v5280_v58 }
 0x5db   :  { %4374 = vmatprep.subr.bf16.mxu0 %v4734_v0 }
 0x5dc   :  { %3682 = vmatmul.mubr.f32.vlgmr.msra.gmra.mrb[16].mxu1 %v5390_v46 }
 0x5dd   :  { %4352 = vmatpush3.bf16.msra.mxu1 %v5229_v8  ;;  %3751 = vmatprep.mubr.msk.f32.mxu1 %vm4735_vm0, %v4736_v1 }
 0x5de   :  { %4353 = vmatprep.subr.bf16.mxu1 %v4734_v0 }
 0x5e1   :  { %4355 = vmatpush3.bf16.msra.mxu1 %v5236_v26 }
 0x5e2   :  { %4356 = vmatprep.subr.bf16.mxu1 %v4734_v0 }
 0x5e5   :  { %4358 = vmatpush3.bf16.msra.mxu1 %v5244_v36 }
 0x5e6   :  { %4359 = vmatprep.subr.bf16.mxu1 %v4734_v0 }
 0x5e9   :  { %4361 = vmatpush3.bf16.msra.mxu1 %v5253_v47 }
 0x5ea   :  { %4362 = vmatprep.subr.bf16.mxu1 %v4734_v0 }
 0x5ed   :  { %4364 = vmatpush3.bf16.msra.mxu1 %v5261_v57 }
 0x5ee   :  { %4365 = vmatprep.subr.bf16.mxu1 %v4734_v0 }
 0x5f1   :  { %4367 = vmatpush3.bf16.msra.mxu1 %v5269_v27 }
 0x5f2   :  { %4368 = vmatprep.subr.bf16.mxu1 %v4734_v0 }
 0x5f5   :  { %4370 = vmatpush3.bf16.msra.mxu1 %v5276_v39 }
 0x5f6   :  { %4371 = vmatprep.subr.bf16.mxu1 %v4734_v0 }
 0x5f9   :  { %4373 = vmatpush3.bf16.msra.mxu1 %v5284_v60 }
 0x5fa   :  { %4398 = vmatprep.subr.bf16.mxu1 %v4734_v0 }
 0x68f   :  { %v1750_v55 = vpop.f32.mrb[14].mxu1  ;;  %v1843_v63 = vpop.f32.mrb[16].mxu0 }
 0x690   :  { %v1751_v2 = vadd.f32 %v5374_v10, %v1750_v55  ;;  %v3613_v52 = vpop.f32.mrb[15].mxu1  ;;  %v3648_v6 = vpop.f32.mrb[17].mxu0  ;;  %v1844_v53 = vadd.f32 %v5380_v20, %v1843_v63 }
 0x692   :  { %v1942_v13 = vadd.f32 %v1941_v51, %v1751_v2  ;;  %v1951_v62 = vadd.f32 %v1950_v56, %v1844_v53  ;;  %v2566_v56 = vld [vmem:[#allocation6 + $0x38] sm:$0xff] }
 0x694   :  { %v2634_v14 = vmul.f32 -1.442695, %v1942_v13  ;;  %v2635_v3 = vmul.f32 -1.442695, %v1951_v62 }
 0x696   :  { %4532 = vpow2.f32 %v2634_v14 }
 0x697   :  { %4534 = vpow2.f32 %v2635_v3 }
 0x6a0   :  { %v4533_v11 = vpop.eup %4532 }
 0x6a1   :  { %v1946_v23 = vadd.f32 1.0, %v4533_v11  ;;  %v4535_v24 = vpop.eup %4534 }
 0x6a2   :  { %v1955_v18 = vadd.f32 1.0, %v4535_v24 }
 0x6a3   :  { %4536 = vrcp.f32 %v1946_v23 }
 0x6a4   :  { %4538 = vrcp.f32 %v1955_v18 }
 0x6ad   :  { %v4537_v32 = vpop.eup %4536 }
 0x6ae   :  { %v4539_v43 = vpop.eup %4538 }
 0x6af   :  { %v1936_v29 = vpop.f32.mrb[16].mxu1  ;;  %v1963_v48 = vsub.f32 1.0, %v4539_v43  ;;  %v1965_v5 = vmul.f32 %v4539_v43, %v5390_v46 }
 0x6b0   :  { %v1937_v30 = vadd.f32 %v5386_v37, %v1936_v29  ;;  %v3683_v31 = vpop.f32.mrb[17].mxu1  ;;  %v2575_v29 = vld [vmem:[#allocation8 + $0x38] sm:$0xff] }
 0x6b2   :  { %v1960_v38 = vmul.f32 %v4537_v32, %v1937_v30 }
 0x6b4   :  { %v1961_v42 = vadd.f32 %v1960_v38, %v1959_v25 }
 0x6b6   :  { %4540 = vtanh.f32 %v1961_v42 }
 0x6c0   :  { %v4541_v49 = vpop.eup %4540 }
 0x6c1   :  { %v1964_v44 = vmul.f32 %v4541_v49, %v1963_v48 }
 0x6c3   :  { %v5454_v19 = vadd.f32 %v1965_v5, %v1964_v44 }
 0x6c5   :  { %3717 = vmatmul.mubr.f32.vlgmr.msra.gmra.mrb[18].mxu0 %v5454_v19  ;;  %1968 = vst [vmem:[#allocation14 + $0x28] sm:$0xff] %v5454_v19  ;;  %3752 = vmatmul.mubr.f32.vlgmr.msra.gmra.mrb[18].mxu1 %v5454_v19 }
 0x6c6   :  { %4376 = vmatpush3.bf16.msra.mxu0 %v5295_v54  ;;  %3786 = vmatprep.mubr.msk.f32.mxu0 %vm4735_vm0, %v4736_v1 }
 0x6c7   :  { %4377 = vmatprep.subr.bf16.mxu0 %v4734_v0  ;;  %4400 = vmatpush3.bf16.msra.mxu1 %v5227_v59 }
 0x6c8   :  { %4401 = vmatprep.subr.bf16.mxu1 %v4734_v0  ;;  %3821 = vmatprep.mubr.msk.f32.mxu1 %vm4735_vm0, %v4736_v1 }
 0x6ca   :  { %4379 = vmatpush3.bf16.msra.mxu0 %v5303_v7 }
 0x6cb   :  { %4380 = vmatprep.subr.bf16.mxu0 %v4734_v0  ;;  %4403 = vmatpush3.bf16.msra.mxu1 %v5232_v17 }
 0x6cc   :  { %4404 = vmatprep.subr.bf16.mxu1 %v4734_v0 }
 0x6ce   :  { %4382 = vmatpush3.bf16.msra.mxu0 %v5313_v16 }
 0x6cf   :  { %4383 = vmatprep.subr.bf16.mxu0 %v4734_v0  ;;  %4406 = vmatpush3.bf16.msra.mxu1 %v5240_v35 }
 0x6d0   :  { %4407 = vmatprep.subr.bf16.mxu1 %v4734_v0 }
 0x6d2   :  { %4385 = vmatpush3.bf16.msra.mxu0 %v5319_v28 }
 0x6d3   :  { %4386 = vmatprep.subr.bf16.mxu0 %v4734_v0  ;;  %4409 = vmatpush3.bf16.msra.mxu1 %v5250_v41 }
 0x6d4   :  { %4410 = vmatprep.subr.bf16.mxu1 %v4734_v0 }
 0x6d6   :  { %4388 = vmatpush3.bf16.msra.mxu0 %v5325_v45 }
 0x6d7   :  { %4389 = vmatprep.subr.bf16.mxu0 %v4734_v0  ;;  %4412 = vmatpush3.bf16.msra.mxu1 %v5258_v50 }
 0x6d8   :  { %4413 = vmatprep.subr.bf16.mxu1 %v4734_v0 }
 0x6da   :  { %4391 = vmatpush3.bf16.msra.mxu0 %v5331_v61 }
 0x6db   :  { %4392 = vmatprep.subr.bf16.mxu0 %v4734_v0  ;;  %4415 = vmatpush3.bf16.msra.mxu1 %v5266_v15 }
 0x6dc   :  { %4416 = vmatprep.subr.bf16.mxu1 %v4734_v0 }
 0x6de   :  { %4394 = vmatpush3.bf16.msra.mxu0 %v5337_v4 }
 0x6df   :  { %4395 = vmatprep.subr.bf16.mxu0 %v4734_v0  ;;  %4418 = vmatpush3.bf16.msra.mxu1 %v5272_v34 }
 0x6e0   :  { %4419 = vmatprep.subr.bf16.mxu1 %v4734_v0 }
 0x6e2   :  { %4397 = vmatpush3.bf16.msra.mxu0 %v5343_v9 }
 0x6e3   :  { %4422 = vmatprep.subr.bf16.mxu0 %v4734_v0  ;;  %4421 = vmatpush3.bf16.msra.mxu1 %v5280_v58 }
 0x6e4   :  { %4446 = vmatprep.subr.bf16.mxu1 %v4734_v0 }
 0x6e5   :  { %3787 = vmatmul.mubr.f32.vlgmr.msra.gmra.mrb[20].mxu0 %v5454_v19 }
 0x6e6   :  { %4424 = vmatpush3.bf16.msra.mxu0 %v5229_v8  ;;  %3856 = vmatprep.mubr.msk.f32.mxu0 %vm4735_vm0, %v4736_v1  ;;  %v2249_v8 = vld [vmem:[#allocation3 + $0x30] sm:$0xff] }
 0x6e7   :  { %4425 = vmatprep.subr.bf16.mxu0 %v4734_v0 }
 0x6ea   :  { %4427 = vmatpush3.bf16.msra.mxu0 %v5236_v26 }
 0x6eb   :  { %4428 = vmatprep.subr.bf16.mxu0 %v4734_v0 }
 0x6ee   :  { %4430 = vmatpush3.bf16.msra.mxu0 %v5244_v36 }
 0x6ef   :  { %4431 = vmatprep.subr.bf16.mxu0 %v4734_v0 }
 0x6f2   :  { %4433 = vmatpush3.bf16.msra.mxu0 %v5253_v47 }
 0x6f3   :  { %4434 = vmatprep.subr.bf16.mxu0 %v4734_v0 }
 0x6f6   :  { %4436 = vmatpush3.bf16.msra.mxu0 %v5261_v57  ;;  %v2258_v57 = vld [vmem:[#allocation6 + $0x30] sm:$0xff] }
 0x6f7   :  { %4437 = vmatprep.subr.bf16.mxu0 %v4734_v0 }
 0x6fa   :  { %4439 = vmatpush3.bf16.msra.mxu0 %v5269_v27 }
 0x6fb   :  { %4440 = vmatprep.subr.bf16.mxu0 %v4734_v0 }
 0x6fe   :  { %4442 = vmatpush3.bf16.msra.mxu0 %v5276_v39 }
 0x6ff   :  { %4443 = vmatprep.subr.bf16.mxu0 %v4734_v0 }
 0x702   :  { %4445 = vmatpush3.bf16.msra.mxu0 %v5284_v60 }
 0x798   :  { %v2058_v59 = vpop.f32.mrb[18].mxu0  ;;  %v2151_v17 = vpop.f32.mrb[18].mxu1 }
 0x799   :  { %v2059_v26 = vadd.f32 %v5374_v10, %v2058_v59  ;;  %v3718_v35 = vpop.f32.mrb[19].mxu0  ;;  %v3753_v36 = vpop.f32.mrb[19].mxu1  ;;  %v2152_v50 = vadd.f32 %v5380_v20, %v2151_v17 }
 0x79b   :  { %v2250_v41 = vadd.f32 %v2249_v8, %v2059_v26  ;;  %v2259_v15 = vadd.f32 %v2258_v57, %v2152_v50 }
 0x79d   :  { %v2639_v47 = vmul.f32 -1.442695, %v2250_v41  ;;  %v2640_v27 = vmul.f32 -1.442695, %v2259_v15 }
 0x79f   :  { %4542 = vpow2.f32 %v2639_v47 }
 0x7a0   :  { %4544 = vpow2.f32 %v2640_v27 }
 0x7a9   :  { %v4543_v34 = vpop.eup %4542 }
 0x7aa   :  { %v2254_v39 = vadd.f32 1.0, %v4543_v34  ;;  %v4545_v58 = vpop.eup %4544 }
 0x7ab   :  { %v2263_v60 = vadd.f32 1.0, %v4545_v58 }
 0x7ac   :  { %4546 = vrcp.f32 %v2254_v39 }
 0x7ad   :  { %4548 = vrcp.f32 %v2263_v60 }
 0x7b6   :  { %v4547_v33 = vpop.eup %4546 }
 0x7b7   :  { %v4549_v51 = vpop.eup %4548 }
 0x7b8   :  { %v2244_v12 = vpop.f32.mrb[20].mxu0  ;;  %v2271_v63 = vsub.f32 1.0, %v4549_v51  ;;  %v2273_v6 = vmul.f32 %v4549_v51, %v5454_v19 }
 0x7b9   :  { %v2245_v21 = vadd.f32 %v5386_v37, %v2244_v12  ;;  %v3788_v22 = vpop.f32.mrb[21].mxu0 }
 0x7bb   :  { %v2268_v46 = vmul.f32 %v4547_v33, %v2245_v21 }
 0x7bd   :  { %v2269_v55 = vadd.f32 %v2268_v46, %v2267_v40 }
 0x7bf   :  { %4550 = vtanh.f32 %v2269_v55 }
 0x7c9   :  { %v4551_v2 = vpop.eup %4550 }
 0x7ca   :  { %v2272_v52 = vmul.f32 %v4551_v2, %v2271_v63 }
 0x7cc   :  { %v2274_v13 = vadd.f32 %v2273_v6, %v2272_v52 }
 0x7ce   :  { %3822 = vmatmul.mubr.f32.vlgmr.msra.gmra.mrb[20].mxu1 %v2274_v13  ;;  %2276 = vst [vmem:[#allocation14 + $0x30] sm:$0xff] %v2274_v13  ;;  %3857 = vmatmul.mubr.f32.vlgmr.msra.gmra.mrb[22].mxu0 %v2274_v13 }
 0x7cf   :  { %4448 = vmatpush3.bf16.msra.mxu1 %v5295_v54  ;;  %3891 = vmatprep.mubr.msk.f32.mxu1 %vm4735_vm0, %v4736_v1  ;;  %v2557_v54 = vld [vmem:[#allocation3 + $0x38] sm:$0xff] }
 0x7d0   :  { %4449 = vmatprep.subr.bf16.mxu1 %v4734_v0 }
 0x7d3   :  { %4451 = vmatpush3.bf16.msra.mxu1 %v5303_v7 }
 0x7d4   :  { %4452 = vmatprep.subr.bf16.mxu1 %v4734_v0 }
 0x7d7   :  { %4454 = vmatpush3.bf16.msra.mxu1 %v5313_v16 }
 0x7d8   :  { %4455 = vmatprep.subr.bf16.mxu1 %v4734_v0 }
 0x7db   :  { %4457 = vmatpush3.bf16.msra.mxu1 %v5319_v28 }
 0x7dc   :  { %4458 = vmatprep.subr.bf16.mxu1 %v4734_v0 }
 0x7df   :  { %4460 = vmatpush3.bf16.msra.mxu1 %v5325_v45 }
 0x7e0   :  { %4461 = vmatprep.subr.bf16.mxu1 %v4734_v0 }
 0x7e3   :  { %4463 = vmatpush3.bf16.msra.mxu1 %v5331_v61 }
 0x7e4   :  { %4464 = vmatprep.subr.bf16.mxu1 %v4734_v0 }
 0x7e7   :  { %4466 = vmatpush3.bf16.msra.mxu1 %v5337_v4 }
 0x7e8   :  { %4467 = vmatprep.subr.bf16.mxu1 %v4734_v0 }
 0x7eb   :  { %4469 = vmatpush3.bf16.msra.mxu1 %v5343_v9 }
 0x7ee   :  { %3892 = vmatmul.mubr.f32.vlgmr.msra.gmra.mrb[22].mxu1 %v2274_v13 }
 0x8a1   :  { %v2366_v1 = vpop.f32.mrb[20].mxu1  ;;  %v2459_v7 = vpop.f32.mrb[22].mxu0 }
 0x8a2   :  { %v2367_v16 = vadd.f32 %v5374_v10, %v2366_v1  ;;  %v3823_v28 = vpop.f32.mrb[21].mxu1  ;;  %v3858_v45 = vpop.f32.mrb[23].mxu0  ;;  %v2460_v61 = vadd.f32 %v5380_v20, %v2459_v7 }
 0x8a4   :  { %v2558_v14 = vadd.f32 %v2557_v54, %v2367_v16  ;;  %v2567_v62 = vadd.f32 %v2566_v56, %v2460_v61 }
 0x8a6   :  { %v2644_v53 = vmul.f32 -1.442695, %v2558_v14  ;;  %v2645_v4 = vmul.f32 -1.442695, %v2567_v62 }
 0x8a8   :  { %4552 = vpow2.f32 %v2644_v53 }
 0x8a9   :  { %4554 = vpow2.f32 %v2645_v4 }
 0x8b2   :  { %v4553_v3 = vpop.eup %4552 }
 0x8b3   :  { %v2562_v0 = vadd.f32 1.0, %v4553_v3  ;;  %v4555_v9 = vpop.eup %4554 }
 0x8b4   :  { %v2571_v11 = vadd.f32 1.0, %v4555_v9 }
 0x8b5   :  { %4556 = vrcp.f32 %v2562_v0 }
 0x8b6   :  { %4558 = vrcp.f32 %v2571_v11 }
 0x8bf   :  { %v4557_v18 = vpop.eup %4556 }
 0x8c0   :  { %v4559_v20 = vpop.eup %4558 }
 0x8c1   :  { %v2552_v23 = vpop.f32.mrb[22].mxu1  ;;  %v2579_v32 = vsub.f32 1.0, %v4559_v20  ;;  %v2581_v38 = vmul.f32 %v4559_v20, %v2274_v13 }
 0x8c2   :  { %v2553_v24 = vadd.f32 %v5386_v37, %v2552_v23  ;;  %v3893_v10 = vpop.f32.mrb[23].mxu1 }
 0x8c4   :  { %v2576_v30 = vmul.f32 %v4557_v18, %v2553_v24 }
 0x8c6   :  { %v2577_v31 = vadd.f32 %v2576_v30, %v2575_v29 }
 0x8c8   :  { %4560 = vtanh.f32 %v2577_v31 }
 0x8d2   :  { %v4561_v25 = vpop.eup %4560 }
 0x8d3   :  { %v2580_v42 = vmul.f32 %v4561_v25, %v2579_v32 }
 0x8d5   :  { %v2582_v43 = vadd.f32 %v2581_v38, %v2580_v42 }
 0x8d7   :  { %2584 = vst [vmem:[#allocation14 + $0x38] sm:$0xff] %v2582_v43 }
 0x8d8   :  { %4705 = shalt.err (!%p4702_p10)
}
 0x8d9   :  { %s4706_s18 = scalar_lea.hbm %s5562_s10, 1024 }
 0x8da   :  { %p4707_p11 = scmp.ne.s32.totalorder %s5562_s10, %s4706_s18  ;;  %p4710_p12 = scmp.lt.u32.totalorder %s4706_s18, %s5562_s10 }
 0x8dc   :  { %p4712_p13 = pnand %p4710_p12, %p4707_p11 }
 0x8de   :  { %4715 = shalt.err (!%p4712_p13)
}
 0x8df   :  { %2597 = dma.vmem_to_hbm [thread:$0]  %s2592_s8, 1024, %s5562_s10, [#allocation5], %s4728_s25, %s4728_s25, %s4729_s26  }
 0x8e0   :  { %4724 = dma.done.wait [#allocation5], 1024  }
 0x8e1   :  { %4725 = vsyncadd [#allocation5], 4294966272 }
 0x8e2   :  { %2601 = vsyncpa [#allocation4], 1 }
 0x8e3   :  { %2602 = vsyncpa [#allocation7], 1 }
 0x8e4   :  { %2603 = vsyncpa [#allocation10], 1 }
 0x8e5   :  { %2604 = vsyncpa [#allocation13], 1 }
 0x8e6   :  { %2605 = vsyncpa [#allocation5], 1 }

</bundles_post_ra>
